<compile_context>
chip_gen: v5e
topology: v5e:2x2
jax: 0.10.0
libtpu: 0.0.40
codegen_flags: <defaults>
</compile_context>

<pallas_src>
import functools

import jax
import jax.numpy as jnp
from jax.experimental import pallas as pl
from jax.experimental.pallas import tpu as pltpu

IN_FEATURES = 1000
K_PAD = 1024          # 1000 padded up to a multiple of 128
H1 = 512
H2 = 256
OUT = 3
OUT_PAD = 128         # lane-dense output slab
TILE_B_MAX = 256      # good for v6e/v7x; still fine (2x128 passes) on v5e


def _round_up(n, m):
    return ((n + m - 1) // m) * m


def _orientation_kernel(x_ref, w1_ref, b1_ref, w2_ref, b2_ref,
                        w3_ref, b3_ref, o_ref):
    # x tile: (TILE_B, 1024) bf16 -> h1 (TILE_B, 512) -> h2 (TILE_B, 256)
    # -> out (TILE_B, 128) f32 (only first 3 columns are meaningful).
    x = x_ref[...]

    # Hoist bias loads once per grid step (JAX does not CSE broadcasts).
    b1 = b1_ref[...]
    b2 = b2_ref[...]
    b3 = b3_ref[...]

    h1 = jnp.dot(x, w1_ref[...], preferred_element_type=jnp.float32) + b1
    h1 = jnp.maximum(h1, 0.0).astype(x.dtype)     # ReLU; Dropout -> identity

    h2 = jnp.dot(h1, w2_ref[...], preferred_element_type=jnp.float32) + b2
    h2 = jnp.maximum(h2, 0.0).astype(x.dtype)     # ReLU; Dropout -> identity

    out = jnp.dot(h2, w3_ref[...], preferred_element_type=jnp.float32) + b3
    o_ref[...] = out.astype(o_ref.dtype)


@functools.partial(jax.jit, static_argnames=())
def orientation_forward(x, params):
    """x: (B, 1000) float32 -> rotation: (B, 3) float32."""
    w1, b1, w2, b2, w3, b3 = params
    B = x.shape[0]

    # ---- layout / dtype prep (folds into the surrounding jit) ----------
    # Pad K: 1000 -> 1024 on both x and w1 (zeros, so the product is exact).
    x_p = jnp.pad(x, ((0, 0), (0, K_PAD - IN_FEATURES)))
    w1_p = jnp.pad(w1, ((0, K_PAD - IN_FEATURES), (0, 0)))
    # Pad the tiny 3-wide output to a lane-dense 128-wide slab.
    w3_p = jnp.pad(w3, ((0, 0), (0, OUT_PAD - OUT)))
    b3_p = jnp.pad(b3, ((0, 0), (0, OUT_PAD - OUT)))

    # bf16 weights/activations halve HBM traffic & feed the MXU natively;
    # accumulation stays f32 (preferred_element_type) and biases stay f32.
    x_p = x_p.astype(jnp.bfloat16)
    w1_p = w1_p.astype(jnp.bfloat16)
    w2_b = w2.astype(jnp.bfloat16)
    w3_p = w3_p.astype(jnp.bfloat16)

    # Batch tiling: multiple of 8 rows, padded so the grid divides evenly.
    tile_b = min(TILE_B_MAX, _round_up(B, 8))
    b_pad = _round_up(B, tile_b)
    if b_pad != B:
        x_p = jnp.pad(x_p, ((0, b_pad - B), (0, 0)))
    grid = (b_pad // tile_b,)

    flops = 2 * B * (IN_FEATURES * H1 + H1 * H2 + H2 * OUT)
    bytes_accessed = (
        x_p.size * 2                                    # bf16 activations in
        + (w1_p.size + w2_b.size + w3_p.size) * 2       # bf16 weights
        + (b1.size + b2.size + b3_p.size) * 4           # f32 biases
        + b_pad * OUT_PAD * 4                           # f32 output slab
    )

    pinned = lambda shape: pl.BlockSpec(shape, lambda i: (0, 0))

    out_padded = pl.pallas_call(
        _orientation_kernel,
        out_shape=jax.ShapeDtypeStruct((b_pad, OUT_PAD), jnp.float32),
        grid=grid,
        in_specs=[
            pl.BlockSpec((tile_b, K_PAD), lambda i: (i, 0)),   # x tile
            pinned((K_PAD, H1)),                               # w1
            pinned((1, H1)),                                   # b1
            pinned((H1, H2)),                                  # w2
            pinned((1, H2)),                                   # b2
            pinned((H2, OUT_PAD)),                             # w3 (padded)
            pinned((1, OUT_PAD)),                              # b3 (padded)
        ],
        out_specs=pl.BlockSpec((tile_b, OUT_PAD), lambda i: (i, 0)),
        compiler_params=pltpu.CompilerParams(
            dimension_semantics=("parallel",)),
        cost_estimate=pl.CostEstimate(
            flops=flops, transcendentals=0, bytes_accessed=bytes_accessed),
    )(x_p, w1_p, b1, w2_b, b2, w3_p, b3_p)

    return out_padded[:B, :OUT]


def init_params(key):
    """Deterministic init matching nn.Linear shapes.

    PyTorch stores Linear weights as (out, in); we store the transposed
    (in, out) layout so the kernel can do x @ W directly.
    Uses uniform(-1/sqrt(fan_in), 1/sqrt(fan_in)) like nn.Linear's default.
    """
    ks = jax.random.split(key, 6)

    def lin(kw, kb, fan_in, fan_out):
        bound = 1.0 / jnp.sqrt(jnp.float32(fan_in))
        w = jax.random.uniform(kw, (fan_in, fan_out), jnp.float32,
                               minval=-bound, maxval=bound)
        b = jax.random.uniform(kb, (1, fan_out), jnp.float32,
                               minval=-bound, maxval=bound)
        return w, b

    w1, b1 = lin(ks[0], ks[1], IN_FEATURES, H1)
    w2, b2 = lin(ks[2], ks[3], H1, H2)
    w3, b3 = lin(ks[4], ks[5], H2, OUT)
    return (w1, b1, w2, b2, w3, b3)


def reference_forward(x, params):
    """Plain-JAX f32 reference of the same forward pass."""
    w1, b1, w2, b2, w3, b3 = params
    h1 = jnp.maximum(x @ w1 + b1, 0.0)
    h2 = jnp.maximum(h1 @ w2 + b2, 0.0)
    return h2 @ w3 + b3


if __name__ == "__main__":
    key = jax.random.PRNGKey(0)
    kx, kp = jax.random.split(key)

    B = 8  # small batch (also exercises the batch-pad / tail path)
    x = jax.random.normal(kx, (B, IN_FEATURES), jnp.float32)
    params = init_params(kp)

    rotation = orientation_forward(x, params)
    rotation = jax.block_until_ready(rotation)

    ref = reference_forward(x, params)
    assert rotation.shape == (B, OUT)
    # bf16 weights/activations -> compare against the f32 reference with a
    # correspondingly looser tolerance.
    assert jnp.allclose(rotation, ref, atol=5e-2, rtol=5e-2), \
        "mismatch vs reference"

    print("KERNEL_OK")
</pallas_src>

<mosaic_0001>
module attributes {stable_mosaic.version = 11 : i64} {
  func.func @_orientation_kernel(%arg0: i32, %arg1: memref<8x1024xbf16, #tpu.memory_space<vmem>>, %arg2: memref<1024x512xbf16, #tpu.memory_space<vmem>>, %arg3: memref<1x512xf32, #tpu.memory_space<vmem>>, %arg4: memref<512x256xbf16, #tpu.memory_space<vmem>>, %arg5: memref<1x256xf32, #tpu.memory_space<vmem>>, %arg6: memref<256x128xbf16, #tpu.memory_space<vmem>>, %arg7: memref<1x128xf32, #tpu.memory_space<vmem>>, %arg8: memref<8x128xf32, #tpu.memory_space<vmem>>) attributes {dimension_semantics = [#tpu.dimension_semantics<parallel>], iteration_bounds = array<i64: 1>, scalar_prefetch = 0 : i64, scratch_operands = 0 : i64, tpu.core_type = #tpu.core_type<tc>, window_params = [{transform_indices = @transform_0, window_bounds = array<i64: 8, 1024>}, {pipeline_mode = #tpu.pipeline_mode<synchronous>, transform_indices = @transform_1, window_bounds = array<i64: 1024, 512>}, {pipeline_mode = #tpu.pipeline_mode<synchronous>, transform_indices = @transform_2, window_bounds = array<i64: 1, 512>}, {pipeline_mode = #tpu.pipeline_mode<synchronous>, transform_indices = @transform_3, window_bounds = array<i64: 512, 256>}, {pipeline_mode = #tpu.pipeline_mode<synchronous>, transform_indices = @transform_4, window_bounds = array<i64: 1, 256>}, {pipeline_mode = #tpu.pipeline_mode<synchronous>, transform_indices = @transform_5, window_bounds = array<i64: 256, 128>}, {pipeline_mode = #tpu.pipeline_mode<synchronous>, transform_indices = @transform_6, window_bounds = array<i64: 1, 128>}, {transform_indices = @transform_7, window_bounds = array<i64: 8, 128>}]} {
    %c0 = arith.constant 0 : index
    %c0_0 = arith.constant 0 : index
    %0 = vector.load %arg1[%c0, %c0_0] : memref<8x1024xbf16, #tpu.memory_space<vmem>>, vector<8x1024xbf16>
    %c0_1 = arith.constant 0 : index
    %c0_2 = arith.constant 0 : index
    %1 = vector.load %arg3[%c0_1, %c0_2] : memref<1x512xf32, #tpu.memory_space<vmem>>, vector<1x512xf32>
    %c0_3 = arith.constant 0 : index
    %c0_4 = arith.constant 0 : index
    %2 = vector.load %arg5[%c0_3, %c0_4] : memref<1x256xf32, #tpu.memory_space<vmem>>, vector<1x256xf32>
    %c0_5 = arith.constant 0 : index
    %c0_6 = arith.constant 0 : index
    %3 = vector.load %arg7[%c0_5, %c0_6] : memref<1x128xf32, #tpu.memory_space<vmem>>, vector<1x128xf32>
    %c0_7 = arith.constant 0 : index
    %c0_8 = arith.constant 0 : index
    %4 = vector.load %arg2[%c0_7, %c0_8] : memref<1024x512xbf16, #tpu.memory_space<vmem>>, vector<1024x512xbf16>
    %cst = arith.constant dense<0.000000e+00> : vector<8x512xf32>
    %5 = tpu.matmul %0, %4, %cst {dimension_numbers = #tpu.dot_dimension_numbers<[1], [0], [0], [1], [0, 0, 1, 1], [], []>} : vector<8x1024xbf16>, vector<1024x512xbf16>, vector<8x512xf32> -> vector<8x512xf32>
    %6 = vector.broadcast %1 : vector<1x512xf32> to vector<8x512xf32>
    %7 = arith.addf %5, %6 : vector<8x512xf32>
    %cst_9 = arith.constant 0.000000e+00 : f32
    %8 = vector.broadcast %cst_9 : f32 to vector<8x512xf32>
    %9 = arith.maximumf %7, %8 : vector<8x512xf32>
    %10 = arith.truncf %9 : vector<8x512xf32> to vector<8x512xbf16>
    %c0_10 = arith.constant 0 : index
    %c0_11 = arith.constant 0 : index
    %11 = vector.load %arg4[%c0_10, %c0_11] : memref<512x256xbf16, #tpu.memory_space<vmem>>, vector<512x256xbf16>
    %cst_12 = arith.constant dense<0.000000e+00> : vector<8x256xf32>
    %12 = tpu.matmul %10, %11, %cst_12 {dimension_numbers = #tpu.dot_dimension_numbers<[1], [0], [0], [1], [0, 0, 1, 1], [], []>} : vector<8x512xbf16>, vector<512x256xbf16>, vector<8x256xf32> -> vector<8x256xf32>
    %13 = vector.broadcast %2 : vector<1x256xf32> to vector<8x256xf32>
    %14 = arith.addf %12, %13 : vector<8x256xf32>
    %cst_13 = arith.constant 0.000000e+00 : f32
    %15 = vector.broadcast %cst_13 : f32 to vector<8x256xf32>
    %16 = arith.maximumf %14, %15 : vector<8x256xf32>
    %17 = arith.truncf %16 : vector<8x256xf32> to vector<8x256xbf16>
    %c0_14 = arith.constant 0 : index
    %c0_15 = arith.constant 0 : index
    %18 = vector.load %arg6[%c0_14, %c0_15] : memref<256x128xbf16, #tpu.memory_space<vmem>>, vector<256x128xbf16>
    %cst_16 = arith.constant dense<0.000000e+00> : vector<8x128xf32>
    %19 = tpu.matmul %17, %18, %cst_16 {dimension_numbers = #tpu.dot_dimension_numbers<[1], [0], [0], [1], [0, 0, 1, 1], [], []>} : vector<8x256xbf16>, vector<256x128xbf16>, vector<8x128xf32> -> vector<8x128xf32>
    %20 = vector.broadcast %3 : vector<1x128xf32> to vector<8x128xf32>
    %21 = arith.addf %19, %20 : vector<8x128xf32>
    %c0_17 = arith.constant 0 : index
    %c0_18 = arith.constant 0 : index
    %22 = vector.load %arg8[%c0_17, %c0_18] : memref<8x128xf32, #tpu.memory_space<vmem>>, vector<8x128xf32>
    tpu.vector_store %arg8[%c0_17, %c0_18], %21 {strides = array<i32>} : memref<8x128xf32, #tpu.memory_space<vmem>>, vector<8x128xf32>,
    return
  }
  func.func @transform_0(%arg0: i32) -> (i32, i32) {
    %c0_i32 = arith.constant 0 : i32
    %c0_i32_0 = arith.constant 0 : i32
    return %arg0, %c0_i32 : i32, i32
  }
  func.func @transform_1(%arg0: i32) -> (i32, i32) {
    %c0_i32 = arith.constant 0 : i32
    %c0_i32_0 = arith.constant 0 : i32
    %c0_i32_1 = arith.constant 0 : i32
    return %c0_i32, %c0_i32_0 : i32, i32
  }
  func.func @transform_2(%arg0: i32) -> (i32, i32) {
    %c0_i32 = arith.constant 0 : i32
    %c0_i32_0 = arith.constant 0 : i32
    %c0_i32_1 = arith.constant 0 : i32
    return %c0_i32, %c0_i32_0 : i32, i32
  }
  func.func @transform_3(%arg0: i32) -> (i32, i32) {
    %c0_i32 = arith.constant 0 : i32
    %c0_i32_0 = arith.constant 0 : i32
    %c0_i32_1 = arith.constant 0 : i32
    return %c0_i32, %c0_i32_0 : i32, i32
  }
  func.func @transform_4(%arg0: i32) -> (i32, i32) {
    %c0_i32 = arith.constant 0 : i32
    %c0_i32_0 = arith.constant 0 : i32
    %c0_i32_1 = arith.constant 0 : i32
    return %c0_i32, %c0_i32_0 : i32, i32
  }
  func.func @transform_5(%arg0: i32) -> (i32, i32) {
    %c0_i32 = arith.constant 0 : i32
    %c0_i32_0 = arith.constant 0 : i32
    %c0_i32_1 = arith.constant 0 : i32
    return %c0_i32, %c0_i32_0 : i32, i32
  }
  func.func @transform_6(%arg0: i32) -> (i32, i32) {
    %c0_i32 = arith.constant 0 : i32
    %c0_i32_0 = arith.constant 0 : i32
    %c0_i32_1 = arith.constant 0 : i32
    return %c0_i32, %c0_i32_0 : i32, i32
  }
  func.func @transform_7(%arg0: i32) -> (i32, i32) {
    %c0_i32 = arith.constant 0 : i32
    %c0_i32_0 = arith.constant 0 : i32
    return %arg0, %c0_i32 : i32, i32
  }
}

</mosaic_0001>

<bundles_post_ra>
// kernel: orientation_forward.1
= control target key start
LH: loop header
LB: loop body
LE: loop exit
PB: predicated region body
PF: predicated region fallthrough
CT: control target
= control target key end

     0   :  { %s6491_s1 = inlined_call_operand.vmem [shape: bf16[1024,512], index: 1, kind: input, shape index: {}]   ;;  %s6492_s0 = inlined_call_operand.vmem [shape: bf16[8,1024], index: 0, kind: input, shape index: {}]   ;;  %s6493_s2 = inlined_call_operand.vmem [shape: f32[1,512], index: 2, kind: input, shape index: {}]   ;;  %s6494_s3 = inlined_call_operand.vmem [shape: bf16[512,256], index: 3, kind: input, shape index: {}]   ;;  %s6495_s4 = inlined_call_operand.vmem [shape: f32[1,256], index: 4, kind: input, shape index: {}]   ;;  %s6496_s6 = inlined_call_operand.vmem [shape: f32[1,128], index: 6, kind: input, shape index: {}]   ;;  %s6497_s5 = inlined_call_operand.vmem [shape: bf16[256,128], index: 5, kind: input, shape index: {}]   ;;  %s6498_s7 = inlined_call_operand.vmem [shape: f32[8,128], index: 7, kind: output, shape index: {}]  }
   0x1   :  { %v2803_v0 = vld [vmem:[%s6491_s1 + $0xe0] sm:$0xf]  ;;  %v4063_v1 = vld [vmem:[%s6491_s1 + $0xec] sm:$0xf0] }
   0x2   :  { %v2931_v2 = vld [vmem:[%s6491_s1 + $0x1e0] sm:$0xf]  ;;  %v2804_v3 = vor.u32 %v4063_v1, %v2803_v0  ;;  %v4095_v4 = vld [vmem:[%s6491_s1 + $0x1ec] sm:$0xf0] }
   0x3   :  { %v3059_v5 = vld [vmem:[%s6491_s1 + $0x2e0] sm:$0xf]  ;;  %v4127_v6 = vld [vmem:[%s6491_s1 + $0x2ec] sm:$0xf0]  ;;  %v2932_v7 = vor.u32 %v4095_v4, %v2931_v2 }
   0x4   :  { %v3060_v8 = vor.u32 %v4127_v6, %v3059_v5  ;;  %v3187_v9 = vld [vmem:[%s6491_s1 + $0x3e0] sm:$0xf]  ;;  %v4159_v10 = vld [vmem:[%s6491_s1 + $0x3ec] sm:$0xf0]  ;;  %1606 = vmatpush.bf16.msra.mxu0 %v2804_v3 }
   0x5   :  { %v2787_v11 = vld [vmem:[%s6491_s1 + $0xc0] sm:$0xf]  ;;  %v3188_v12 = vor.u32 %v4159_v10, %v3187_v9  ;;  %v4059_v13 = vld [vmem:[%s6491_s1 + $0xcc] sm:$0xf0]  ;;  %1619 = vmatpush.bf16.msra.mxu1 %v2932_v7 }
   0x6   :  { %v2915_v14 = vld [vmem:[%s6491_s1 + $0x1c0] sm:$0xf]  ;;  %v4091_v15 = vld [vmem:[%s6491_s1 + $0x1cc] sm:$0xf0]  ;;  %1632 = vmatpush.bf16.msra.mxu2 %v3060_v8  ;;  %v2788_v16 = vor.u32 %v4059_v13, %v2787_v11 }
   0x7   :  { %v2916_v17 = vor.u32 %v4091_v15, %v2915_v14  ;;  %v3043_v18 = vld [vmem:[%s6491_s1 + $0x2c0] sm:$0xf]  ;;  %v4123_v19 = vld [vmem:[%s6491_s1 + $0x2cc] sm:$0xf0]  ;;  %1645 = vmatpush.bf16.msra.mxu3 %v3188_v12 }
   0x8   :  { %v3171_v20 = vld [vmem:[%s6491_s1 + $0x3c0] sm:$0xf]  ;;  %v3044_v21 = vor.u32 %v4123_v19, %v3043_v18  ;;  %v4155_v22 = vld [vmem:[%s6491_s1 + $0x3cc] sm:$0xf0]  ;;  %1607 = vmatpush.bf16.msra.mxu0 %v2788_v16 }
   0x9   :  { %v2771_v23 = vld [vmem:[%s6491_s1 + $0xa0] sm:$0xf]  ;;  %v4055_v24 = vld [vmem:[%s6491_s1 + $0xac] sm:$0xf0]  ;;  %v3172_v25 = vor.u32 %v4155_v22, %v3171_v20  ;;  %1620 = vmatpush.bf16.msra.mxu1 %v2916_v17 }
   0xa   :  { %v2899_v26 = vld [vmem:[%s6491_s1 + $0x1a0] sm:$0xf]  ;;  %v4087_v27 = vld [vmem:[%s6491_s1 + $0x1ac] sm:$0xf0]  ;;  %v2772_v29 = vor.u32 %v4055_v24, %v2771_v23  ;;  %1633 = vmatpush.bf16.msra.mxu2 %v3044_v21 }
   0xb   :  { %v3027_v28 = vld [vmem:[%s6491_s1 + $0x2a0] sm:$0xf]  ;;  %v4119_v30 = vld [vmem:[%s6491_s1 + $0x2ac] sm:$0xf0]  ;;  %v2900_v33 = vor.u32 %v4087_v27, %v2899_v26  ;;  %1646 = vmatpush.bf16.msra.mxu3 %v3172_v25 }
   0xc   :  { %v3155_v31 = vld [vmem:[%s6491_s1 + $0x3a0] sm:$0xf]  ;;  %v4151_v32 = vld [vmem:[%s6491_s1 + $0x3ac] sm:$0xf0]  ;;  %v3028_v34 = vor.u32 %v4119_v30, %v3027_v28  ;;  %1608 = vmatpush.bf16.msra.mxu0 %v2772_v29 }
   0xd   :  { %v2755_v35 = vld [vmem:[%s6491_s1 + $0x80] sm:$0xf]  ;;  %v4051_v36 = vld [vmem:[%s6491_s1 + $0x8c] sm:$0xf0]  ;;  %v3156_v38 = vor.u32 %v4151_v32, %v3155_v31  ;;  %1621 = vmatpush.bf16.msra.mxu1 %v2900_v33 }
   0xe   :  { %v2883_v37 = vld [vmem:[%s6491_s1 + $0x180] sm:$0xf]  ;;  %v4083_v39 = vld [vmem:[%s6491_s1 + $0x18c] sm:$0xf0]  ;;  %v2756_v44 = vor.u32 %v4051_v36, %v2755_v35  ;;  %1634 = vmatpush.bf16.msra.mxu2 %v3028_v34 }
   0xf   :  { %v3011_v40 = vld [vmem:[%s6491_s1 + $0x280] sm:$0xf]  ;;  %v4115_v41 = vld [vmem:[%s6491_s1 + $0x28c] sm:$0xf0]  ;;  %v2884_v45 = vor.u32 %v4083_v39, %v2883_v37  ;;  %1647 = vmatpush.bf16.msra.mxu3 %v3156_v38 }
  0x10   :  { %v3139_v42 = vld [vmem:[%s6491_s1 + $0x380] sm:$0xf]  ;;  %v4147_v43 = vld [vmem:[%s6491_s1 + $0x38c] sm:$0xf0]  ;;  %v3012_v46 = vor.u32 %v4115_v41, %v3011_v40  ;;  %1609 = vmatpush.bf16.msra.mxu0 %v2756_v44 }
  0x11   :  { %v2739_v47 = vld [vmem:[%s6491_s1 + $0x60] sm:$0xf]  ;;  %v4047_v48 = vld [vmem:[%s6491_s1 + $0x6c] sm:$0xf0]  ;;  %v3140_v50 = vor.u32 %v4147_v43, %v3139_v42  ;;  %1622 = vmatpush.bf16.msra.mxu1 %v2884_v45 }
  0x12   :  { %v2867_v49 = vld [vmem:[%s6491_s1 + $0x160] sm:$0xf]  ;;  %v4079_v51 = vld [vmem:[%s6491_s1 + $0x16c] sm:$0xf0]  ;;  %v2740_v56 = vor.u32 %v4047_v48, %v2739_v47  ;;  %1635 = vmatpush.bf16.msra.mxu2 %v3012_v46 }
  0x13   :  { %v2995_v52 = vld [vmem:[%s6491_s1 + $0x260] sm:$0xf]  ;;  %v4111_v53 = vld [vmem:[%s6491_s1 + $0x26c] sm:$0xf0]  ;;  %v2868_v57 = vor.u32 %v4079_v51, %v2867_v49  ;;  %1648 = vmatpush.bf16.msra.mxu3 %v3140_v50 }
  0x14   :  { %v3123_v54 = vld [vmem:[%s6491_s1 + $0x360] sm:$0xf]  ;;  %v4143_v55 = vld [vmem:[%s6491_s1 + $0x36c] sm:$0xf0]  ;;  %v2996_v58 = vor.u32 %v4111_v53, %v2995_v52  ;;  %1610 = vmatpush.bf16.msra.mxu0 %v2740_v56 }
  0x15   :  { %v2723_v59 = vld [vmem:[%s6491_s1 + $0x40] sm:$0xf]  ;;  %v4043_v60 = vld [vmem:[%s6491_s1 + $0x4c] sm:$0xf0]  ;;  %v3124_v62 = vor.u32 %v4143_v55, %v3123_v54  ;;  %1623 = vmatpush.bf16.msra.mxu1 %v2868_v57 }
  0x16   :  { %v2851_v61 = vld [vmem:[%s6491_s1 + $0x140] sm:$0xf]  ;;  %v4075_v63 = vld [vmem:[%s6491_s1 + $0x14c] sm:$0xf0]  ;;  %v2724_v4 = vor.u32 %v4043_v60, %v2723_v59  ;;  %1636 = vmatpush.bf16.msra.mxu2 %v2996_v58 }
  0x17   :  { %v2979_v0 = vld [vmem:[%s6491_s1 + $0x240] sm:$0xf]  ;;  %v4107_v1 = vld [vmem:[%s6491_s1 + $0x24c] sm:$0xf0]  ;;  %v2852_v5 = vor.u32 %v4075_v63, %v2851_v61  ;;  %1649 = vmatpush.bf16.msra.mxu3 %v3124_v62 }
  0x18   :  { %v3107_v2 = vld [vmem:[%s6491_s1 + $0x340] sm:$0xf]  ;;  %v4139_v3 = vld [vmem:[%s6491_s1 + $0x34c] sm:$0xf0]  ;;  %v2980_v6 = vor.u32 %v4107_v1, %v2979_v0  ;;  %1611 = vmatpush.bf16.msra.mxu0 %v2724_v4 }
  0x19   :  { %v2707_v7 = vld [vmem:[%s6491_s1 + $0x20] sm:$0xf]  ;;  %v4039_v8 = vld [vmem:[%s6491_s1 + $0x2c] sm:$0xf0]  ;;  %v3108_v10 = vor.u32 %v4139_v3, %v3107_v2  ;;  %1624 = vmatpush.bf16.msra.mxu1 %v2852_v5  ;;  %v27_v2 = vld [vmem:[%s6492_s0 + $0x8] sm:$0xff] }
  0x1a   :  { %v2835_v9 = vld [vmem:[%s6491_s1 + $0x120] sm:$0xf]  ;;  %v4071_v11 = vld [vmem:[%s6491_s1 + $0x12c] sm:$0xf0]  ;;  %v2708_v16 = vor.u32 %v4039_v8, %v2707_v7  ;;  %1637 = vmatpush.bf16.msra.mxu2 %v2980_v6  ;;  %v304_v8 = vunpack.c.l.b16 %v27_v2 }
  0x1b   :  { %v2963_v12 = vld [vmem:[%s6491_s1 + $0x220] sm:$0xf]  ;;  %v4103_v13 = vld [vmem:[%s6491_s1 + $0x22c] sm:$0xf0]  ;;  %v2836_v19 = vor.u32 %v4071_v11, %v2835_v9  ;;  %1650 = vmatpush.bf16.msra.mxu3 %v3108_v10  ;;  %v305_v10 = vunpack.c.h.b16 %v27_v2 }
  0x1c   :  { %v3091_v14 = vld [vmem:[%s6491_s1 + $0x320] sm:$0xf]  ;;  %v4135_v15 = vld [vmem:[%s6491_s1 + $0x32c] sm:$0xf0]  ;;  %v2964_v20 = vor.u32 %v4103_v13, %v2963_v12  ;;  %1612 = vmatpush.bf16.msra.mxu0 %v2708_v16 }
  0x1d   :  { %v2691_v17 = vld [vmem:[%s6491_s1] sm:$0xf]  ;;  %v4035_v18 = vld [vmem:[%s6491_s1 + $0xc] sm:$0xf0]  ;;  %v3092_v24 = vor.u32 %v4135_v15, %v3091_v14  ;;  %1625 = vmatpush.bf16.msra.mxu1 %v2836_v19 }
  0x1e   :  { %v2819_v21 = vld [vmem:[%s6491_s1 + $0x100] sm:$0xf]  ;;  %v4067_v22 = vld [vmem:[%s6491_s1 + $0x10c] sm:$0xf0]  ;;  %v2692_v31 = vor.u32 %v4035_v18, %v2691_v17  ;;  %1638 = vmatpush.bf16.msra.mxu2 %v2964_v20  ;;  %v4705_v18 = vpack.c.b16 %v304_v8, %v304_v8  ;;  %v4709_v20 = vpack.c.b16 %v305_v10, %v305_v10  ;;  %v4061_v8 = vld [vmem:[%s6491_s1 + $0xe4] sm:$0xf] }
  0x1f   :  { %v2947_v23 = vld [vmem:[%s6491_s1 + $0x200] sm:$0xf]  ;;  %v4099_v25 = vld [vmem:[%s6491_s1 + $0x20c] sm:$0xf0]  ;;  %v2820_v35 = vor.u32 %v4067_v22, %v2819_v21  ;;  %1651 = vmatpush.bf16.msra.mxu3 %v3092_v24  ;;  %v4093_v10 = vld [vmem:[%s6491_s1 + $0x1e4] sm:$0xf] }
  0x20   :  { %v3075_v26 = vld [vmem:[%s6491_s1 + $0x300] sm:$0xf]  ;;  %v4131_v27 = vld [vmem:[%s6491_s1 + $0x30c] sm:$0xf0]  ;;  %v2948_v36 = vor.u32 %v4099_v25, %v2947_v23  ;;  %1613 = vmatpush.bf16.msra.mxu0 %v2692_v31 }
  0x21   :  { %v3315_v28 = vld [vmem:[%s6491_s1 + $0x4e0] sm:$0xf]  ;;  %v4191_v29 = vld [vmem:[%s6491_s1 + $0x4ec] sm:$0xf0]  ;;  %v3076_v39 = vor.u32 %v4131_v27, %v3075_v26  ;;  %1626 = vmatpush.bf16.msra.mxu1 %v2820_v35 }
  0x22   :  { %v3443_v30 = vld [vmem:[%s6491_s1 + $0x5e0] sm:$0xf]  ;;  %v4223_v32 = vld [vmem:[%s6491_s1 + $0x5ec] sm:$0xf0]  ;;  %v3316_v40 = vor.u32 %v4191_v29, %v3315_v28  ;;  %1639 = vmatpush.bf16.msra.mxu2 %v2948_v36 }
  0x23   :  { %v3571_v33 = vld [vmem:[%s6491_s1 + $0x6e0] sm:$0xf]  ;;  %v4255_v34 = vld [vmem:[%s6491_s1 + $0x6ec] sm:$0xf0]  ;;  %v3444_v41 = vor.u32 %v4223_v32, %v3443_v30  ;;  %1652 = vmatpush.bf16.msra.mxu3 %v3076_v39 }
  0x24   :  { %v3699_v37 = vld [vmem:[%s6491_s1 + $0x7e0] sm:$0xf]  ;;  %v4287_v38 = vld [vmem:[%s6491_s1 + $0x7ec] sm:$0xf0]  ;;  %v3572_v42 = vor.u32 %v4255_v34, %v3571_v33  ;;  %1658 = vmatpush.bf16.msrb.mxu0 %v3316_v40 }
  0x25   :  { %v3299_v43 = vld [vmem:[%s6491_s1 + $0x4c0] sm:$0xf]  ;;  %v4187_v44 = vld [vmem:[%s6491_s1 + $0x4cc] sm:$0xf0]  ;;  %v3700_v46 = vor.u32 %v4287_v38, %v3699_v37  ;;  %1671 = vmatpush.bf16.msrb.mxu1 %v3444_v41  ;;  %1640 = vmatmul.bf16.vlgmr.msra.gmra.mxu2 %v4705_v18 }
  0x26   :  { %v3427_v45 = vld [vmem:[%s6491_s1 + $0x5c0] sm:$0xf]  ;;  %v4219_v47 = vld [vmem:[%s6491_s1 + $0x5cc] sm:$0xf0]  ;;  %v3300_v52 = vor.u32 %v4187_v44, %v3299_v43  ;;  %1684 = vmatpush.bf16.msrb.mxu2 %v3572_v42  ;;  %1653 = vmatmul.bf16.vlgmr.msra.gmra.mxu3 %v4709_v20 }
  0x27   :  { %v3555_v48 = vld [vmem:[%s6491_s1 + $0x6c0] sm:$0xf]  ;;  %v4251_v49 = vld [vmem:[%s6491_s1 + $0x6cc] sm:$0xf0]  ;;  %v3428_v54 = vor.u32 %v4219_v47, %v3427_v45  ;;  %1697 = vmatpush.bf16.msrb.mxu3 %v3700_v46 }
  0x28   :  { %v3683_v50 = vld [vmem:[%s6491_s1 + $0x7c0] sm:$0xf]  ;;  %v4283_v51 = vld [vmem:[%s6491_s1 + $0x7cc] sm:$0xf0]  ;;  %v3556_v55 = vor.u32 %v4251_v49, %v3555_v48  ;;  %1659 = vmatpush.bf16.msrb.mxu0 %v3300_v52 }
  0x29   :  { %v3283_v53 = vld [vmem:[%s6491_s1 + $0x4a0] sm:$0xf]  ;;  %v4183_v56 = vld [vmem:[%s6491_s1 + $0x4ac] sm:$0xf0]  ;;  %v3684_v59 = vor.u32 %v4283_v51, %v3683_v50  ;;  %1672 = vmatpush.bf16.msrb.mxu1 %v3428_v54 }
  0x2a   :  { %v3411_v57 = vld [vmem:[%s6491_s1 + $0x5a0] sm:$0xf]  ;;  %v4215_v58 = vld [vmem:[%s6491_s1 + $0x5ac] sm:$0xf0]  ;;  %v3284_v0 = vor.u32 %v4183_v56, %v3283_v53  ;;  %1685 = vmatpush.bf16.msrb.mxu2 %v3556_v55 }
  0x2b   :  { %v3539_v60 = vld [vmem:[%s6491_s1 + $0x6a0] sm:$0xf]  ;;  %v4247_v61 = vld [vmem:[%s6491_s1 + $0x6ac] sm:$0xf0]  ;;  %v3412_v1 = vor.u32 %v4215_v58, %v3411_v57  ;;  %1698 = vmatpush.bf16.msrb.mxu3 %v3684_v59 }
  0x2c   :  { %v3667_v62 = vld [vmem:[%s6491_s1 + $0x7a0] sm:$0xf]  ;;  %v4279_v63 = vld [vmem:[%s6491_s1 + $0x7ac] sm:$0xf0]  ;;  %v3540_v4 = vor.u32 %v4247_v61, %v3539_v60  ;;  %1660 = vmatpush.bf16.msrb.mxu0 %v3284_v0 }
  0x2d   :  { %v26_v3 = vld [vmem:[%s6492_s0] sm:$0xff]  ;;  %v4179_v6 = vld [vmem:[%s6491_s1 + $0x48c] sm:$0xf0]  ;;  %v3668_v11 = vor.u32 %v4279_v63, %v3667_v62  ;;  %1673 = vmatpush.bf16.msrb.mxu1 %v3412_v1 }
  0x2e   :  { %v3267_v5 = vld [vmem:[%s6491_s1 + $0x480] sm:$0xf]  ;;  %v302_v9 = vunpack.c.l.b16 %v26_v3  ;;  %v4211_v12 = vld [vmem:[%s6491_s1 + $0x58c] sm:$0xf0]  ;;  %v303_v15 = vunpack.c.h.b16 %v26_v3  ;;  %1686 = vmatpush.bf16.msrb.mxu2 %v3540_v4  ;;  %v29_v3 = vld [vmem:[%s6492_s0 + $0x18] sm:$0xff] }
  0x2f   :  { %v3395_v7 = vld [vmem:[%s6491_s1 + $0x580] sm:$0xf]  ;;  %v4243_v14 = vld [vmem:[%s6491_s1 + $0x68c] sm:$0xf0]  ;;  %v3268_v21 = vor.u32 %v4179_v6, %v3267_v5  ;;  %1699 = vmatpush.bf16.msrb.mxu3 %v3668_v11 }
  0x30   :  { %v3523_v13 = vld [vmem:[%s6491_s1 + $0x680] sm:$0xf]  ;;  %v4275_v17 = vld [vmem:[%s6491_s1 + $0x78c] sm:$0xf0]  ;;  %v4707_v19 = vpack.c.b16 %v302_v9, %v302_v9  ;;  %v4711_v22 = vpack.c.b16 %v303_v15, %v303_v15  ;;  %v3396_v23 = vor.u32 %v4211_v12, %v3395_v7  ;;  %v2805_v9 = vld [vmem:[%s6491_s1 + $0xf0] sm:$0xf0]  ;;  %v308_v15 = vunpack.c.l.b16 %v29_v3 }
  0x31   :  { %v3651_v16 = vld [vmem:[%s6491_s1 + $0x780] sm:$0xf]  ;;  %v3524_v24 = vor.u32 %v4243_v14, %v3523_v13  ;;  %v4175_v26 = vld [vmem:[%s6491_s1 + $0x46c] sm:$0xf0]  ;;  %1661 = vmatpush.bf16.msrb.mxu0 %v3268_v21  ;;  %v2933_v12 = vld [vmem:[%s6491_s1 + $0x1f0] sm:$0xf0] }
  0x32   :  { %v3251_v25 = vld [vmem:[%s6491_s1 + $0x460] sm:$0xf]  ;;  %v3652_v28 = vor.u32 %v4275_v17, %v3651_v16  ;;  %v4207_v29 = vld [vmem:[%s6491_s1 + $0x56c] sm:$0xf0]  ;;  %1614 = vmatmul.bf16.vlgmr.msra.gmra.mxu0 %v4707_v19  ;;  %1627 = vmatmul.bf16.vlgmr.msra.gmra.mxu1 %v4711_v22  ;;  %v4125_v13 = vld [vmem:[%s6491_s1 + $0x2e4] sm:$0xf] }
  0x33   :  { %v3379_v27 = vld [vmem:[%s6491_s1 + $0x560] sm:$0xf]  ;;  %v4239_v31 = vld [vmem:[%s6491_s1 + $0x66c] sm:$0xf0]  ;;  %v3252_v34 = vor.u32 %v4175_v26, %v3251_v25  ;;  %1674 = vmatpush.bf16.msrb.mxu1 %v3396_v23  ;;  %1687 = vmatpush.bf16.msrb.mxu2 %v3524_v24  ;;  %v3061_v14 = vld [vmem:[%s6491_s1 + $0x2f0] sm:$0xf0]  ;;  %v309_v25 = vunpack.c.h.b16 %v29_v3 }
  0x34   :  { %v3507_v30 = vld [vmem:[%s6491_s1 + $0x660] sm:$0xf]  ;;  %v4271_v33 = vld [vmem:[%s6491_s1 + $0x76c] sm:$0xf0]  ;;  %v3380_v35 = vor.u32 %v4207_v29, %v3379_v27  ;;  %1700 = vmatpush.bf16.msrb.mxu3 %v3652_v28  ;;  %v4157_v21 = vld [vmem:[%s6491_s1 + $0x3e4] sm:$0xf]  ;;  %v2808_v27 = vor.u32 %v4061_v8, %v2805_v9  ;;  %v2936_v29 = vor.u32 %v4093_v10, %v2933_v12 }
  0x35   :  { %v3635_v32 = vld [vmem:[%s6491_s1 + $0x760] sm:$0xf]  ;;  %v3508_v36 = vor.u32 %v4239_v31, %v3507_v30  ;;  %v4171_v38 = vld [vmem:[%s6491_s1 + $0x44c] sm:$0xf0]  ;;  %1662 = vmatpush.bf16.msrb.mxu0 %v3252_v34  ;;  %v3189_v23 = vld [vmem:[%s6491_s1 + $0x3f0] sm:$0xf0]  ;;  %v3064_v30 = vor.u32 %v4125_v13, %v3061_v14 }
  0x36   :  { %v3235_v37 = vld [vmem:[%s6491_s1 + $0x440] sm:$0xf]  ;;  %v3636_v40 = vor.u32 %v4271_v33, %v3635_v32  ;;  %v4203_v41 = vld [vmem:[%s6491_s1 + $0x54c] sm:$0xf0]  ;;  %v4057_v31 = vld [vmem:[%s6491_s1 + $0xc4] sm:$0xf]  ;;  %v3192_v34 = vor.u32 %v4157_v21, %v3189_v23 }
  0x37   :  { %v3363_v39 = vld [vmem:[%s6491_s1 + $0x540] sm:$0xf]  ;;  %v4235_v43 = vld [vmem:[%s6491_s1 + $0x64c] sm:$0xf0]  ;;  %v3236_v46 = vor.u32 %v4171_v38, %v3235_v37  ;;  %1675 = vmatpush.bf16.msrb.mxu1 %v3380_v35  ;;  %1688 = vmatpush.bf16.msrb.mxu2 %v3508_v36  ;;  %v2789_v32 = vld [vmem:[%s6491_s1 + $0xd0] sm:$0xf0]  ;;  %v4861_v38 = vpack.c.b16 %v308_v15, %v308_v15 }
  0x38   :  { %v3491_v42 = vld [vmem:[%s6491_s1 + $0x640] sm:$0xf]  ;;  %v4267_v45 = vld [vmem:[%s6491_s1 + $0x74c] sm:$0xf0]  ;;  %v3364_v47 = vor.u32 %v4203_v41, %v3363_v39  ;;  %1701 = vmatpush.bf16.msrb.mxu3 %v3636_v40  ;;  %v4089_v33 = vld [vmem:[%s6491_s1 + $0x1c4] sm:$0xf] }
  0x39   :  { %v3619_v44 = vld [vmem:[%s6491_s1 + $0x740] sm:$0xf]  ;;  %v3492_v48 = vor.u32 %v4235_v43, %v3491_v42  ;;  %v4167_v50 = vld [vmem:[%s6491_s1 + $0x42c] sm:$0xf0]  ;;  %1663 = vmatpush.bf16.msrb.mxu0 %v3236_v46  ;;  %v2917_v35 = vld [vmem:[%s6491_s1 + $0x1d0] sm:$0xf0]  ;;  %v4871_v42 = vpack.c.b16 %v309_v25, %v309_v25  ;;  %v2792_v43 = vor.u32 %v4057_v31, %v2789_v32 }
  0x3a   :  { %v3219_v49 = vld [vmem:[%s6491_s1 + $0x420] sm:$0xf]  ;;  %v3620_v52 = vor.u32 %v4267_v45, %v3619_v44  ;;  %v4199_v53 = vld [vmem:[%s6491_s1 + $0x52c] sm:$0xf0]  ;;  %v4121_v36 = vld [vmem:[%s6491_s1 + $0x2c4] sm:$0xf]  ;;  %v2920_v45 = vor.u32 %v4089_v33, %v2917_v35 }
  0x3b   :  { %v3347_v51 = vld [vmem:[%s6491_s1 + $0x520] sm:$0xf]  ;;  %v4231_v55 = vld [vmem:[%s6491_s1 + $0x62c] sm:$0xf0]  ;;  %v3220_v59 = vor.u32 %v4167_v50, %v3219_v49  ;;  %1676 = vmatpush.bf16.msrb.mxu1 %v3364_v47  ;;  %1689 = vmatpush.bf16.msrb.mxu2 %v3492_v48  ;;  %v3045_v37 = vld [vmem:[%s6491_s1 + $0x2d0] sm:$0xf0] }
  0x3c   :  { %v3475_v54 = vld [vmem:[%s6491_s1 + $0x620] sm:$0xf]  ;;  %v4263_v57 = vld [vmem:[%s6491_s1 + $0x72c] sm:$0xf0]  ;;  %v3348_v63 = vor.u32 %v4199_v53, %v3347_v51  ;;  %1702 = vmatpush.bf16.msrb.mxu3 %v3620_v52  ;;  %v4153_v39 = vld [vmem:[%s6491_s1 + $0x3c4] sm:$0xf]  ;;  %v3048_v46 = vor.u32 %v4121_v36, %v3045_v37 }
  0x3d   :  { %v3603_v56 = vld [vmem:[%s6491_s1 + $0x720] sm:$0xf]  ;;  %v4163_v60 = vld [vmem:[%s6491_s1 + $0x40c] sm:$0xf0]  ;;  %v3476_v0 = vor.u32 %v4231_v55, %v3475_v54  ;;  %1664 = vmatpush.bf16.msrb.mxu0 %v3220_v59  ;;  %v3173_v40 = vld [vmem:[%s6491_s1 + $0x3d0] sm:$0xf0] }
  0x3e   :  { %v3203_v58 = vld [vmem:[%s6491_s1 + $0x400] sm:$0xf]  ;;  %v4195_v62 = vld [vmem:[%s6491_s1 + $0x50c] sm:$0xf0]  ;;  %v3604_v4 = vor.u32 %v4263_v57, %v3603_v56  ;;  %v4053_v47 = vld [vmem:[%s6491_s1 + $0xa4] sm:$0xf]  ;;  %v3176_v50 = vor.u32 %v4153_v39, %v3173_v40 }
  0x3f   :  { %v3331_v61 = vld [vmem:[%s6491_s1 + $0x500] sm:$0xf]  ;;  %v4227_v2 = vld [vmem:[%s6491_s1 + $0x60c] sm:$0xf0]  ;;  %v3204_v11 = vor.u32 %v4163_v60, %v3203_v58  ;;  %1677 = vmatpush.bf16.msrb.mxu1 %v3348_v63  ;;  %1690 = vmatpush.bf16.msrb.mxu2 %v3476_v0  ;;  %v2773_v48 = vld [vmem:[%s6491_s1 + $0xb0] sm:$0xf0] }
  0x40   :  { %v3459_v1 = vld [vmem:[%s6491_s1 + $0x600] sm:$0xf]  ;;  %v4259_v6 = vld [vmem:[%s6491_s1 + $0x70c] sm:$0xf0]  ;;  %v3332_v16 = vor.u32 %v4195_v62, %v3331_v61  ;;  %1703 = vmatpush.bf16.msrb.mxu3 %v3604_v4  ;;  %v4085_v49 = vld [vmem:[%s6491_s1 + $0x1a4] sm:$0xf]  ;;  %v2776_v56 = vor.u32 %v4053_v47, %v2773_v48 }
  0x41   :  { %v3587_v5 = vld [vmem:[%s6491_s1 + $0x700] sm:$0xf]  ;;  %v28_v7 = vld [vmem:[%s6492_s0 + $0x10] sm:$0xff]  ;;  %v3460_v17 = vor.u32 %v4227_v2, %v3459_v1  ;;  %1665 = vmatpush.bf16.msrb.mxu0 %v3204_v11  ;;  %v4117_v52 = vld [vmem:[%s6491_s1 + $0x2a4] sm:$0xf] }
  0x42   :  { %v306_v24 = vunpack.c.l.b16 %v28_v7  ;;  %v3588_v26 = vor.u32 %v4259_v6, %v3587_v5  ;;  %v307_v28 = vunpack.c.h.b16 %v28_v7  ;;  %v2901_v51 = vld [vmem:[%s6491_s1 + $0x1b0] sm:$0xf0]  ;;  %v4149_v54 = vld [vmem:[%s6491_s1 + $0x3a4] sm:$0xf] }
  0x43   :  { %1678 = vmatpush.bf16.msrb.mxu1 %v3332_v16  ;;  %1691 = vmatpush.bf16.msrb.mxu2 %v3460_v17  ;;  %v3029_v53 = vld [vmem:[%s6491_s1 + $0x2b0] sm:$0xf0]  ;;  %v2904_v57 = vor.u32 %v4085_v49, %v2901_v51  ;;  %v4049_v59 = vld [vmem:[%s6491_s1 + $0x84] sm:$0xf] }
  0x44   :  { %v4869_v41 = vpack.c.b16 %v306_v24, %v306_v24  ;;  %1704 = vmatpush.bf16.msrb.mxu3 %v3588_v26  ;;  %v4873_v44 = vpack.c.b16 %v307_v28, %v307_v28  ;;  %v3157_v55 = vld [vmem:[%s6491_s1 + $0x3b0] sm:$0xf0]  ;;  %v3032_v58 = vor.u32 %v4117_v52, %v3029_v53  ;;  %v4081_v61 = vld [vmem:[%s6491_s1 + $0x184] sm:$0xf] }
  0x45   :  { %1710 = vmatpush.bf16.msra.mxu0 %v2808_v27  ;;  %v2757_v60 = vld [vmem:[%s6491_s1 + $0x90] sm:$0xf0]  ;;  %v3160_v62 = vor.u32 %v4149_v54, %v3157_v55  ;;  %v4113_v0 = vld [vmem:[%s6491_s1 + $0x284] sm:$0xf] }
  0x46   :  { %1692 = vmatmul.bf16.vlgmr.msrb.gmra.mxu2 %v4861_v38  ;;  %1666 = vmatmul.bf16.vlgmr.msrb.gmra.mxu0 %v4869_v41  ;;  %v2885_v63 = vld [vmem:[%s6491_s1 + $0x190] sm:$0xf0]  ;;  %v4145_v2 = vld [vmem:[%s6491_s1 + $0x384] sm:$0xf]  ;;  %v2760_v4 = vor.u32 %v4049_v59, %v2757_v60 }
  0x47   :  { %1723 = vmatpush.bf16.msra.mxu1 %v2936_v29  ;;  %1736 = vmatpush.bf16.msra.mxu2 %v3064_v30  ;;  %v3013_v1 = vld [vmem:[%s6491_s1 + $0x290] sm:$0xf0]  ;;  %v2888_v5 = vor.u32 %v4081_v61, %v2885_v63  ;;  %v4045_v7 = vld [vmem:[%s6491_s1 + $0x64] sm:$0xf] }
  0x48   :  { %1749 = vmatpush.bf16.msra.mxu3 %v3192_v34  ;;  %1679 = vmatmul.bf16.vlgmr.msrb.gmra.mxu1 %v4873_v44  ;;  %v3141_v3 = vld [vmem:[%s6491_s1 + $0x390] sm:$0xf0]  ;;  %v3016_v6 = vor.u32 %v4113_v0, %v3013_v1  ;;  %v4077_v9 = vld [vmem:[%s6491_s1 + $0x164] sm:$0xf] }
  0x49   :  { %1705 = vmatmul.bf16.vlgmr.msrb.gmra.mxu3 %v4871_v42  ;;  %1711 = vmatpush.bf16.msra.mxu0 %v2792_v43  ;;  %v2741_v8 = vld [vmem:[%s6491_s1 + $0x70] sm:$0xf0]  ;;  %v3144_v10 = vor.u32 %v4145_v2, %v3141_v3  ;;  %v4109_v12 = vld [vmem:[%s6491_s1 + $0x264] sm:$0xf] }
  0x4a   :  { %v2869_v11 = vld [vmem:[%s6491_s1 + $0x170] sm:$0xf0]  ;;  %v4141_v14 = vld [vmem:[%s6491_s1 + $0x364] sm:$0xf]  ;;  %v2744_v16 = vor.u32 %v4045_v7, %v2741_v8 }
  0x4b   :  { %1724 = vmatpush.bf16.msra.mxu1 %v2920_v45  ;;  %1737 = vmatpush.bf16.msra.mxu2 %v3048_v46  ;;  %v2997_v13 = vld [vmem:[%s6491_s1 + $0x270] sm:$0xf0]  ;;  %v2872_v17 = vor.u32 %v4077_v9, %v2869_v11  ;;  %v4041_v23 = vld [vmem:[%s6491_s1 + $0x44] sm:$0xf] }
  0x4c   :  { %1750 = vmatpush.bf16.msra.mxu3 %v3176_v50  ;;  %v3125_v15 = vld [vmem:[%s6491_s1 + $0x370] sm:$0xf0]  ;;  %v3000_v21 = vor.u32 %v4109_v12, %v2997_v13  ;;  %v4073_v25 = vld [vmem:[%s6491_s1 + $0x144] sm:$0xf] }
  0x4d   :  { %1712 = vmatpush.bf16.msra.mxu0 %v2776_v56  ;;  %v2725_v24 = vld [vmem:[%s6491_s1 + $0x50] sm:$0xf0]  ;;  %v3128_v26 = vor.u32 %v4141_v14, %v3125_v15  ;;  %v4105_v28 = vld [vmem:[%s6491_s1 + $0x244] sm:$0xf] }
  0x4e   :  { %v2853_v27 = vld [vmem:[%s6491_s1 + $0x150] sm:$0xf0]  ;;  %v4137_v30 = vld [vmem:[%s6491_s1 + $0x344] sm:$0xf]  ;;  %v2728_v32 = vor.u32 %v4041_v23, %v2725_v24 }
  0x4f   :  { %1725 = vmatpush.bf16.msra.mxu1 %v2904_v57  ;;  %1738 = vmatpush.bf16.msra.mxu2 %v3032_v58  ;;  %v2981_v29 = vld [vmem:[%s6491_s1 + $0x250] sm:$0xf0]  ;;  %v2856_v33 = vor.u32 %v4073_v25, %v2853_v27  ;;  %v4037_v35 = vld [vmem:[%s6491_s1 + $0x24] sm:$0xf] }
  0x50   :  { %1751 = vmatpush.bf16.msra.mxu3 %v3160_v62  ;;  %v3109_v31 = vld [vmem:[%s6491_s1 + $0x350] sm:$0xf0]  ;;  %v2984_v34 = vor.u32 %v4105_v28, %v2981_v29  ;;  %v4069_v37 = vld [vmem:[%s6491_s1 + $0x124] sm:$0xf] }
  0x51   :  { %1713 = vmatpush.bf16.msra.mxu0 %v2760_v4  ;;  %v2709_v36 = vld [vmem:[%s6491_s1 + $0x30] sm:$0xf0]  ;;  %v3112_v39 = vor.u32 %v4137_v30, %v3109_v31  ;;  %v4101_v43 = vld [vmem:[%s6491_s1 + $0x224] sm:$0xf] }
  0x52   :  { %v2837_v40 = vld [vmem:[%s6491_s1 + $0x130] sm:$0xf0]  ;;  %v4133_v46 = vld [vmem:[%s6491_s1 + $0x324] sm:$0xf]  ;;  %v2712_v48 = vor.u32 %v4037_v35, %v2709_v36 }
  0x53   :  { %1726 = vmatpush.bf16.msra.mxu1 %v2888_v5  ;;  %1739 = vmatpush.bf16.msra.mxu2 %v3016_v6  ;;  %v2965_v45 = vld [vmem:[%s6491_s1 + $0x230] sm:$0xf0]  ;;  %v4033_v49 = vld [vmem:[%s6491_s1 + $0x4] sm:$0xf]  ;;  %v2840_v51 = vor.u32 %v4069_v37, %v2837_v40 }
  0x54   :  { %1752 = vmatpush.bf16.msra.mxu3 %v3144_v10  ;;  %v3093_v47 = vld [vmem:[%s6491_s1 + $0x330] sm:$0xf0]  ;;  %v2968_v52 = vor.u32 %v4101_v43, %v2965_v45  ;;  %v4065_v53 = vld [vmem:[%s6491_s1 + $0x104] sm:$0xf] }
  0x55   :  { %1714 = vmatpush.bf16.msra.mxu0 %v2744_v16  ;;  %v2693_v50 = vld [vmem:[%s6491_s1 + $0x10] sm:$0xf0]  ;;  %v4097_v55 = vld [vmem:[%s6491_s1 + $0x204] sm:$0xf]  ;;  %v3096_v56 = vor.u32 %v4133_v46, %v3093_v47 }
  0x56   :  { %v2821_v54 = vld [vmem:[%s6491_s1 + $0x110] sm:$0xf0]  ;;  %v4129_v58 = vld [vmem:[%s6491_s1 + $0x304] sm:$0xf]  ;;  %v2696_v63 = vor.u32 %v4033_v49, %v2693_v50 }
  0x57   :  { %1727 = vmatpush.bf16.msra.mxu1 %v2872_v17  ;;  %1740 = vmatpush.bf16.msra.mxu2 %v3000_v21  ;;  %v2949_v57 = vld [vmem:[%s6491_s1 + $0x210] sm:$0xf0]  ;;  %v4189_v60 = vld [vmem:[%s6491_s1 + $0x4e4] sm:$0xf]  ;;  %v2824_v3 = vor.u32 %v4065_v53, %v2821_v54 }
  0x58   :  { %1753 = vmatpush.bf16.msra.mxu3 %v3128_v26  ;;  %v3077_v59 = vld [vmem:[%s6491_s1 + $0x310] sm:$0xf0]  ;;  %v4221_v62 = vld [vmem:[%s6491_s1 + $0x5e4] sm:$0xf]  ;;  %v2952_v4 = vor.u32 %v4097_v55, %v2949_v57 }
  0x59   :  { %1715 = vmatpush.bf16.msra.mxu0 %v2728_v32  ;;  %v3317_v61 = vld [vmem:[%s6491_s1 + $0x4f0] sm:$0xf0]  ;;  %v4253_v1 = vld [vmem:[%s6491_s1 + $0x6e4] sm:$0xf]  ;;  %v3080_v7 = vor.u32 %v4129_v58, %v3077_v59 }
  0x5a   :  { %v3445_v0 = vld [vmem:[%s6491_s1 + $0x5f0] sm:$0xf0]  ;;  %v4285_v5 = vld [vmem:[%s6491_s1 + $0x7e4] sm:$0xf]  ;;  %v3320_v8 = vor.u32 %v4189_v60, %v3317_v61 }
  0x5b   :  { %1728 = vmatpush.bf16.msra.mxu1 %v2856_v33  ;;  %1741 = vmatpush.bf16.msra.mxu2 %v2984_v34  ;;  %v3573_v2 = vld [vmem:[%s6491_s1 + $0x6f0] sm:$0xf0]  ;;  %v3448_v9 = vor.u32 %v4221_v62, %v3445_v0  ;;  %v4185_v11 = vld [vmem:[%s6491_s1 + $0x4c4] sm:$0xf] }
  0x5c   :  { %1754 = vmatpush.bf16.msra.mxu3 %v3112_v39  ;;  %v3701_v6 = vld [vmem:[%s6491_s1 + $0x7f0] sm:$0xf0]  ;;  %v3576_v10 = vor.u32 %v4253_v1, %v3573_v2  ;;  %v4217_v13 = vld [vmem:[%s6491_s1 + $0x5c4] sm:$0xf] }
  0x5d   :  { %1716 = vmatpush.bf16.msra.mxu0 %v2712_v48  ;;  %v3301_v12 = vld [vmem:[%s6491_s1 + $0x4d0] sm:$0xf0]  ;;  %v3704_v14 = vor.u32 %v4285_v5, %v3701_v6  ;;  %v4249_v16 = vld [vmem:[%s6491_s1 + $0x6c4] sm:$0xf] }
  0x5e   :  { %v3429_v15 = vld [vmem:[%s6491_s1 + $0x5d0] sm:$0xf0]  ;;  %v4281_v21 = vld [vmem:[%s6491_s1 + $0x7c4] sm:$0xf]  ;;  %v3304_v24 = vor.u32 %v4185_v11, %v3301_v12 }
  0x5f   :  { %1729 = vmatpush.bf16.msra.mxu1 %v2840_v51  ;;  %1742 = vmatpush.bf16.msra.mxu2 %v2968_v52  ;;  %v3557_v17 = vld [vmem:[%s6491_s1 + $0x6d0] sm:$0xf0]  ;;  %v3432_v25 = vor.u32 %v4217_v13, %v3429_v15  ;;  %v4181_v27 = vld [vmem:[%s6491_s1 + $0x4a4] sm:$0xf] }
  0x60   :  { %1755 = vmatpush.bf16.msra.mxu3 %v3096_v56  ;;  %v3685_v23 = vld [vmem:[%s6491_s1 + $0x7d0] sm:$0xf0]  ;;  %v3560_v26 = vor.u32 %v4249_v16, %v3557_v17  ;;  %v4213_v29 = vld [vmem:[%s6491_s1 + $0x5a4] sm:$0xf] }
  0x61   :  { %1717 = vmatpush.bf16.msra.mxu0 %v2696_v63  ;;  %v3285_v28 = vld [vmem:[%s6491_s1 + $0x4b0] sm:$0xf0]  ;;  %v3688_v30 = vor.u32 %v4281_v21, %v3685_v23  ;;  %v4245_v32 = vld [vmem:[%s6491_s1 + $0x6a4] sm:$0xf] }
  0x62   :  { %v3413_v31 = vld [vmem:[%s6491_s1 + $0x5b0] sm:$0xf0]  ;;  %v4277_v34 = vld [vmem:[%s6491_s1 + $0x7a4] sm:$0xf]  ;;  %v3288_v36 = vor.u32 %v4181_v27, %v3285_v28 }
  0x63   :  { %1730 = vmatpush.bf16.msra.mxu1 %v2824_v3  ;;  %1743 = vmatpush.bf16.msra.mxu2 %v2952_v4  ;;  %v3541_v33 = vld [vmem:[%s6491_s1 + $0x6b0] sm:$0xf0]  ;;  %v3416_v37 = vor.u32 %v4213_v29, %v3413_v31  ;;  %v4177_v40 = vld [vmem:[%s6491_s1 + $0x484] sm:$0xf] }
  0x64   :  { %1756 = vmatpush.bf16.msra.mxu3 %v3080_v7  ;;  %v3669_v35 = vld [vmem:[%s6491_s1 + $0x7b0] sm:$0xf0]  ;;  %1718 = vmatmul.bf16.vlgmr.msra.gmra.mxu0 %v4707_v19  ;;  %v3544_v39 = vor.u32 %v4245_v32, %v3541_v33  ;;  %v4209_v45 = vld [vmem:[%s6491_s1 + $0x584] sm:$0xf] }
  0x65   :  { %1762 = vmatpush.bf16.msrb.mxu0 %v3320_v8  ;;  %v3269_v43 = vld [vmem:[%s6491_s1 + $0x490] sm:$0xf0]  ;;  %v3672_v46 = vor.u32 %v4277_v34, %v3669_v35  ;;  %v4241_v48 = vld [vmem:[%s6491_s1 + $0x684] sm:$0xf] }
  0x66   :  { %1744 = vmatmul.bf16.vlgmr.msra.gmra.mxu2 %v4705_v18  ;;  %1731 = vmatmul.bf16.vlgmr.msra.gmra.mxu1 %v4711_v22  ;;  %v3397_v47 = vld [vmem:[%s6491_s1 + $0x590] sm:$0xf0]  ;;  %v4273_v50 = vld [vmem:[%s6491_s1 + $0x784] sm:$0xf]  ;;  %v3272_v52 = vor.u32 %v4177_v40, %v3269_v43  ;;  %v2811_v43 = vld [vmem:[%s6491_s1 + $0xe8] sm:$0xf] }
  0x67   :  { %1775 = vmatpush.bf16.msrb.mxu1 %v3448_v9  ;;  %1788 = vmatpush.bf16.msrb.mxu2 %v3576_v10  ;;  %v3525_v49 = vld [vmem:[%s6491_s1 + $0x690] sm:$0xf0]  ;;  %v3400_v53 = vor.u32 %v4209_v45, %v3397_v47  ;;  %v4173_v55 = vld [vmem:[%s6491_s1 + $0x464] sm:$0xf]  ;;  %v4064_v45 = vld [vmem:[%s6491_s1 + $0xf4] sm:$0xf0] }
  0x68   :  { %1801 = vmatpush.bf16.msrb.mxu3 %v3704_v14  ;;  %v3653_v51 = vld [vmem:[%s6491_s1 + $0x790] sm:$0xf0]  ;;  %v3528_v54 = vor.u32 %v4241_v48, %v3525_v49  ;;  %v4205_v57 = vld [vmem:[%s6491_s1 + $0x564] sm:$0xf]  ;;  %v4096_v48 = vld [vmem:[%s6491_s1 + $0x1f4] sm:$0xf0] }
  0x69   :  { %1757 = vmatmul.bf16.vlgmr.msra.gmra.mxu3 %v4709_v20  ;;  %1763 = vmatpush.bf16.msrb.mxu0 %v3304_v24  ;;  %v3253_v56 = vld [vmem:[%s6491_s1 + $0x470] sm:$0xf0]  ;;  %v3656_v58 = vor.u32 %v4273_v50, %v3653_v51  ;;  %v4237_v60 = vld [vmem:[%s6491_s1 + $0x664] sm:$0xf]  ;;  %v3067_v49 = vld [vmem:[%s6491_s1 + $0x2e8] sm:$0xf] }
  0x6a   :  { %v3381_v59 = vld [vmem:[%s6491_s1 + $0x570] sm:$0xf0]  ;;  %v4269_v62 = vld [vmem:[%s6491_s1 + $0x764] sm:$0xf]  ;;  %v3256_v0 = vor.u32 %v4173_v55, %v3253_v56  ;;  %v4128_v50 = vld [vmem:[%s6491_s1 + $0x2f4] sm:$0xf0]  ;;  %v2812_v56 = vor.u32 %v4064_v45, %v2811_v43 }
  0x6b   :  { %1776 = vmatpush.bf16.msrb.mxu1 %v3432_v25  ;;  %1789 = vmatpush.bf16.msrb.mxu2 %v3560_v26  ;;  %v3509_v61 = vld [vmem:[%s6491_s1 + $0x670] sm:$0xf0]  ;;  %v3384_v1 = vor.u32 %v4205_v57, %v3381_v59  ;;  %v4169_v3 = vld [vmem:[%s6491_s1 + $0x444] sm:$0xf]  ;;  %v2795_v59 = vld [vmem:[%s6491_s1 + $0xc8] sm:$0xf] }
  0x6c   :  { %1802 = vmatpush.bf16.msrb.mxu3 %v3688_v30  ;;  %v3637_v63 = vld [vmem:[%s6491_s1 + $0x770] sm:$0xf0]  ;;  %v3512_v2 = vor.u32 %v4237_v60, %v3509_v61  ;;  %v4201_v5 = vld [vmem:[%s6491_s1 + $0x544] sm:$0xf]  ;;  %v4060_v60 = vld [vmem:[%s6491_s1 + $0xd4] sm:$0xf0] }
  0x6d   :  { %1764 = vmatpush.bf16.msrb.mxu0 %v3288_v36  ;;  %v3237_v4 = vld [vmem:[%s6491_s1 + $0x450] sm:$0xf0]  ;;  %v3640_v6 = vor.u32 %v4269_v62, %v3637_v63  ;;  %v4233_v8 = vld [vmem:[%s6491_s1 + $0x644] sm:$0xf]  ;;  %v2923_v61 = vld [vmem:[%s6491_s1 + $0x1c8] sm:$0xf] }
  0x6e   :  { %v3365_v7 = vld [vmem:[%s6491_s1 + $0x550] sm:$0xf0]  ;;  %v4265_v10 = vld [vmem:[%s6491_s1 + $0x744] sm:$0xf]  ;;  %v3240_v12 = vor.u32 %v4169_v3, %v3237_v4  ;;  %v4092_v63 = vld [vmem:[%s6491_s1 + $0x1d4] sm:$0xf0]  ;;  %v2796_v4 = vor.u32 %v4060_v60, %v2795_v59 }
  0x6f   :  { %1777 = vmatpush.bf16.msrb.mxu1 %v3416_v37  ;;  %1790 = vmatpush.bf16.msrb.mxu2 %v3544_v39  ;;  %v3493_v9 = vld [vmem:[%s6491_s1 + $0x650] sm:$0xf0]  ;;  %v3368_v13 = vor.u32 %v4201_v5, %v3365_v7  ;;  %v4165_v15 = vld [vmem:[%s6491_s1 + $0x424] sm:$0xf]  ;;  %v4156_v3 = vld [vmem:[%s6491_s1 + $0x3d4] sm:$0xf0]  ;;  %v2924_v5 = vor.u32 %v4092_v63, %v2923_v61 }
  0x70   :  { %1803 = vmatpush.bf16.msrb.mxu3 %v3672_v46  ;;  %v3621_v11 = vld [vmem:[%s6491_s1 + $0x750] sm:$0xf0]  ;;  %v3496_v14 = vor.u32 %v4233_v8, %v3493_v9  ;;  %v4197_v17 = vld [vmem:[%s6491_s1 + $0x524] sm:$0xf]  ;;  %v2939_v46 = vld [vmem:[%s6491_s1 + $0x1e8] sm:$0xf] }
  0x71   :  { %1765 = vmatpush.bf16.msrb.mxu0 %v3272_v52  ;;  %v3221_v16 = vld [vmem:[%s6491_s1 + $0x430] sm:$0xf0]  ;;  %v3624_v21 = vor.u32 %v4265_v10, %v3621_v11  ;;  %v4229_v24 = vld [vmem:[%s6491_s1 + $0x624] sm:$0xf]  ;;  %v2940_v57 = vor.u32 %v4096_v48, %v2939_v46  ;;  %v2779_v7 = vld [vmem:[%s6491_s1 + $0xa8] sm:$0xf] }
  0x72   :  { %v3349_v23 = vld [vmem:[%s6491_s1 + $0x530] sm:$0xf0]  ;;  %v4261_v26 = vld [vmem:[%s6491_s1 + $0x724] sm:$0xf]  ;;  %v3224_v28 = vor.u32 %v4165_v15, %v3221_v16  ;;  %v4056_v8 = vld [vmem:[%s6491_s1 + $0xb4] sm:$0xf0] }
  0x73   :  { %1778 = vmatpush.bf16.msrb.mxu1 %v3400_v53  ;;  %1791 = vmatpush.bf16.msrb.mxu2 %v3528_v54  ;;  %v3477_v25 = vld [vmem:[%s6491_s1 + $0x630] sm:$0xf0]  ;;  %v4161_v29 = vld [vmem:[%s6491_s1 + $0x404] sm:$0xf]  ;;  %v3352_v31 = vor.u32 %v4197_v17, %v3349_v23  ;;  %v3195_v53 = vld [vmem:[%s6491_s1 + $0x3e8] sm:$0xf]  ;;  %v2780_v16 = vor.u32 %v4056_v8, %v2779_v7 }
  0x74   :  { %1804 = vmatpush.bf16.msrb.mxu3 %v3656_v58  ;;  %v3605_v27 = vld [vmem:[%s6491_s1 + $0x730] sm:$0xf0]  ;;  %v3480_v32 = vor.u32 %v4229_v24, %v3477_v25  ;;  %v4193_v33 = vld [vmem:[%s6491_s1 + $0x504] sm:$0xf]  ;;  %v4160_v54 = vld [vmem:[%s6491_s1 + $0x3f4] sm:$0xf0]  ;;  %v3068_v58 = vor.u32 %v4128_v50, %v3067_v49 }
  0x75   :  { %1766 = vmatpush.bf16.msrb.mxu0 %v3256_v0  ;;  %v3205_v30 = vld [vmem:[%s6491_s1 + $0x410] sm:$0xf0]  ;;  %v4225_v35 = vld [vmem:[%s6491_s1 + $0x604] sm:$0xf]  ;;  %v3608_v36 = vor.u32 %v4261_v26, %v3605_v27  ;;  %v3196_v62 = vor.u32 %v4160_v54, %v3195_v53  ;;  %v3051_v0 = vld [vmem:[%s6491_s1 + $0x2c8] sm:$0xf] }
  0x76   :  { %v3333_v34 = vld [vmem:[%s6491_s1 + $0x510] sm:$0xf0]  ;;  %v4257_v39 = vld [vmem:[%s6491_s1 + $0x704] sm:$0xf]  ;;  %v3208_v47 = vor.u32 %v4161_v29, %v3205_v30  ;;  %v2907_v9 = vld [vmem:[%s6491_s1 + $0x1a8] sm:$0xf] }
  0x77   :  { %1779 = vmatpush.bf16.msrb.mxu1 %v3384_v1  ;;  %1792 = vmatpush.bf16.msrb.mxu2 %v3512_v2  ;;  %v3461_v37 = vld [vmem:[%s6491_s1 + $0x610] sm:$0xf0]  ;;  %v3336_v51 = vor.u32 %v4193_v33, %v3333_v34  ;;  %v4124_v1 = vld [vmem:[%s6491_s1 + $0x2d4] sm:$0xf0]  ;;  %v3179_v2 = vld [vmem:[%s6491_s1 + $0x3c8] sm:$0xf] }
  0x78   :  { %1805 = vmatpush.bf16.msrb.mxu3 %v3640_v6  ;;  %v3589_v40 = vld [vmem:[%s6491_s1 + $0x710] sm:$0xf0]  ;;  %v3464_v52 = vor.u32 %v4225_v35, %v3461_v37  ;;  %v3052_v6 = vor.u32 %v4124_v1, %v3051_v0  ;;  %v3180_v10 = vor.u32 %v4156_v3, %v3179_v2  ;;  %v4088_v11 = vld [vmem:[%s6491_s1 + $0x1b4] sm:$0xf0]  ;;  %v2763_v23 = vld [vmem:[%s6491_s1 + $0x88] sm:$0xf] }
  0x79   :  { %1767 = vmatpush.bf16.msrb.mxu0 %v3240_v12  ;;  %v3592_v55 = vor.u32 %v4257_v39, %v3589_v40  ;;  %v3035_v12 = vld [vmem:[%s6491_s1 + $0x2a8] sm:$0xf]  ;;  %v4152_v15 = vld [vmem:[%s6491_s1 + $0x3b4] sm:$0xf0]  ;;  %v2908_v17 = vor.u32 %v4088_v11, %v2907_v9 }
  0x7a   :  { %v4052_v24 = vld [vmem:[%s6491_s1 + $0x94] sm:$0xf0]  ;;  %v2891_v25 = vld [vmem:[%s6491_s1 + $0x188] sm:$0xf] }
  0x7b   :  { %1780 = vmatpush.bf16.msrb.mxu1 %v3368_v13  ;;  %1793 = vmatpush.bf16.msrb.mxu2 %v3496_v14  ;;  %v4120_v13 = vld [vmem:[%s6491_s1 + $0x2b4] sm:$0xf0]  ;;  %v3163_v14 = vld [vmem:[%s6491_s1 + $0x3a8] sm:$0xf] }
  0x7c   :  { %1806 = vmatpush.bf16.msrb.mxu3 %v3624_v21  ;;  %v3036_v21 = vor.u32 %v4120_v13, %v3035_v12  ;;  %v3164_v26 = vor.u32 %v4152_v15, %v3163_v14  ;;  %v4084_v27 = vld [vmem:[%s6491_s1 + $0x194] sm:$0xf0]  ;;  %v3147_v30 = vld [vmem:[%s6491_s1 + $0x388] sm:$0xf] }
  0x7d   :  { %1768 = vmatpush.bf16.msrb.mxu0 %v3224_v28  ;;  %v3019_v28 = vld [vmem:[%s6491_s1 + $0x288] sm:$0xf]  ;;  %v4116_v29 = vld [vmem:[%s6491_s1 + $0x294] sm:$0xf0]  ;;  %v2892_v33 = vor.u32 %v4084_v27, %v2891_v25 }
  0x7e   :  { %v3020_v34 = vor.u32 %v4116_v29, %v3019_v28  ;;  %v2747_v35 = vld [vmem:[%s6491_s1 + $0x68] sm:$0xf]  ;;  %v4080_v40 = vld [vmem:[%s6491_s1 + $0x174] sm:$0xf0] }
  0x7f   :  { %1781 = vmatpush.bf16.msrb.mxu1 %v3352_v31  ;;  %1794 = vmatpush.bf16.msrb.mxu2 %v3480_v32  ;;  %v4148_v31 = vld [vmem:[%s6491_s1 + $0x394] sm:$0xf0]  ;;  %v2764_v32 = vor.u32 %v4052_v24, %v2763_v23  ;;  %v2875_v37 = vld [vmem:[%s6491_s1 + $0x168] sm:$0xf] }
  0x80   :  { %1807 = vmatpush.bf16.msrb.mxu3 %v3608_v36  ;;  %v4048_v36 = vld [vmem:[%s6491_s1 + $0x74] sm:$0xf0]  ;;  %v3148_v39 = vor.u32 %v4148_v31, %v3147_v30  ;;  %v3003_v43 = vld [vmem:[%s6491_s1 + $0x268] sm:$0xf]  ;;  %v2876_v49 = vor.u32 %v4080_v40, %v2875_v37 }
  0x81   :  { %1769 = vmatpush.bf16.msrb.mxu0 %v3208_v47  ;;  %v4112_v45 = vld [vmem:[%s6491_s1 + $0x274] sm:$0xf0]  ;;  %v3131_v46 = vld [vmem:[%s6491_s1 + $0x368] sm:$0xf]  ;;  %v2748_v48 = vor.u32 %v4048_v36, %v2747_v35 }
  0x82   :  { %v4144_v47 = vld [vmem:[%s6491_s1 + $0x374] sm:$0xf0]  ;;  %v3004_v50 = vor.u32 %v4112_v45, %v3003_v43  ;;  %v2859_v53 = vld [vmem:[%s6491_s1 + $0x148] sm:$0xf] }
  0x83   :  { %1782 = vmatpush.bf16.msrb.mxu1 %v3336_v51  ;;  %1795 = vmatpush.bf16.msrb.mxu2 %v3464_v52  ;;  %v2731_v51 = vld [vmem:[%s6491_s1 + $0x48] sm:$0xf]  ;;  %v4044_v52 = vld [vmem:[%s6491_s1 + $0x54] sm:$0xf0]  ;;  %v3132_v54 = vor.u32 %v4144_v47, %v3131_v46 }
  0x84   :  { %1808 = vmatpush.bf16.msrb.mxu3 %v3592_v55  ;;  %1770 = vmatmul.bf16.vlgmr.msrb.gmra.mxu0 %v4869_v41  ;;  %v4076_v55 = vld [vmem:[%s6491_s1 + $0x154] sm:$0xf0]  ;;  %v2732_v60 = vor.u32 %v4044_v52, %v2731_v51  ;;  %v2715_v63 = vld [vmem:[%s6491_s1 + $0x28] sm:$0xf] }
  0x85   :  { %1814 = vmatpush.bf16.msra.mxu0 %v2812_v56  ;;  %v2987_v56 = vld [vmem:[%s6491_s1 + $0x248] sm:$0xf]  ;;  %v4140_v59 = vld [vmem:[%s6491_s1 + $0x354] sm:$0xf0]  ;;  %v2860_v61 = vor.u32 %v4076_v55, %v2859_v53 }
  0x86   :  { %1796 = vmatmul.bf16.vlgmr.msrb.gmra.mxu2 %v4861_v38  ;;  %1783 = vmatmul.bf16.vlgmr.msrb.gmra.mxu1 %v4873_v44  ;;  %v4040_v0 = vld [vmem:[%s6491_s1 + $0x34] sm:$0xf0]  ;;  %v2843_v1 = vld [vmem:[%s6491_s1 + $0x128] sm:$0xf] }
  0x87   :  { %1827 = vmatpush.bf16.msra.mxu1 %v2940_v57  ;;  %1840 = vmatpush.bf16.msra.mxu2 %v3068_v58  ;;  %v4108_v57 = vld [vmem:[%s6491_s1 + $0x254] sm:$0xf0]  ;;  %v3115_v58 = vld [vmem:[%s6491_s1 + $0x348] sm:$0xf]  ;;  %v2716_v8 = vor.u32 %v4040_v0, %v2715_v63 }
  0x88   :  { %1853 = vmatpush.bf16.msra.mxu3 %v3196_v62  ;;  %v2988_v62 = vor.u32 %v4108_v57, %v2987_v56  ;;  %v3116_v2 = vor.u32 %v4140_v59, %v3115_v58  ;;  %v4072_v3 = vld [vmem:[%s6491_s1 + $0x134] sm:$0xf0]  ;;  %v2699_v9 = vld [vmem:[%s6491_s1 + $0x8] sm:$0xf] }
  0x89   :  { %1809 = vmatmul.bf16.vlgmr.msrb.gmra.mxu3 %v4871_v42  ;;  %1815 = vmatpush.bf16.msra.mxu0 %v2796_v4  ;;  %v2971_v4 = vld [vmem:[%s6491_s1 + $0x228] sm:$0xf]  ;;  %v4136_v7 = vld [vmem:[%s6491_s1 + $0x334] sm:$0xf0]  ;;  %v2844_v11 = vor.u32 %v4072_v3, %v2843_v1 }
  0x8a   :  { %v2827_v13 = vld [vmem:[%s6491_s1 + $0x108] sm:$0xf]  ;;  %v4068_v14 = vld [vmem:[%s6491_s1 + $0x114] sm:$0xf0] }
  0x8b   :  { %1828 = vmatpush.bf16.msra.mxu1 %v2924_v5  ;;  %1841 = vmatpush.bf16.msra.mxu2 %v3052_v6  ;;  %v4104_v5 = vld [vmem:[%s6491_s1 + $0x234] sm:$0xf0]  ;;  %v3099_v6 = vld [vmem:[%s6491_s1 + $0x328] sm:$0xf]  ;;  %v2828_v31 = vor.u32 %v4068_v14, %v2827_v13 }
  0x8c   :  { %1854 = vmatpush.bf16.msra.mxu3 %v3180_v10  ;;  %v4036_v10 = vld [vmem:[%s6491_s1 + $0x14] sm:$0xf0]  ;;  %v2972_v12 = vor.u32 %v4104_v5, %v2971_v4  ;;  %v2955_v15 = vld [vmem:[%s6491_s1 + $0x208] sm:$0xf] }
  0x8d   :  { %1816 = vmatpush.bf16.msra.mxu0 %v2780_v16  ;;  %v3100_v16 = vor.u32 %v4136_v7, %v3099_v6  ;;  %v4132_v23 = vld [vmem:[%s6491_s1 + $0x314] sm:$0xf0]  ;;  %v3323_v24 = vld [vmem:[%s6491_s1 + $0x4e8] sm:$0xf]  ;;  %v2700_v27 = vor.u32 %v4036_v10, %v2699_v9 }
  0x8e   :  { %v4192_v25 = vld [vmem:[%s6491_s1 + $0x4f4] sm:$0xf0]  ;;  %v3579_v29 = vld [vmem:[%s6491_s1 + $0x6e8] sm:$0xf] }
  0x8f   :  { %1829 = vmatpush.bf16.msra.mxu1 %v2908_v17  ;;  %1842 = vmatpush.bf16.msra.mxu2 %v3036_v21  ;;  %v4100_v17 = vld [vmem:[%s6491_s1 + $0x214] sm:$0xf0]  ;;  %v3083_v21 = vld [vmem:[%s6491_s1 + $0x308] sm:$0xf]  ;;  %v3324_v36 = vor.u32 %v4192_v25, %v3323_v24 }
  0x90   :  { %1855 = vmatpush.bf16.msra.mxu3 %v3164_v26  ;;  %v3451_v26 = vld [vmem:[%s6491_s1 + $0x5e8] sm:$0xf]  ;;  %v4224_v28 = vld [vmem:[%s6491_s1 + $0x5f4] sm:$0xf0]  ;;  %v3084_v35 = vor.u32 %v4132_v23, %v3083_v21 }
  0x91   :  { %1817 = vmatpush.bf16.msra.mxu0 %v2764_v32  ;;  %v4256_v30 = vld [vmem:[%s6491_s1 + $0x6f4] sm:$0xf0]  ;;  %v2956_v32 = vor.u32 %v4100_v17, %v2955_v15  ;;  %v3452_v37 = vor.u32 %v4224_v28, %v3451_v26  ;;  %v3307_v40 = vld [vmem:[%s6491_s1 + $0x4c8] sm:$0xf]  ;;  %v5536_v26 = vld [vmem:[%s6493_s2] sm:$0xf] }
  0x92   :  { %v4188_v43 = vld [vmem:[%s6491_s1 + $0x4d4] sm:$0xf0]  ;;  %v3435_v45 = vld [vmem:[%s6491_s1 + $0x5c8] sm:$0xf] }
  0x93   :  { %1830 = vmatpush.bf16.msra.mxu1 %v2892_v33  ;;  %1843 = vmatpush.bf16.msra.mxu2 %v3020_v34  ;;  %v3707_v33 = vld [vmem:[%s6491_s1 + $0x7e8] sm:$0xf]  ;;  %v4288_v34 = vld [vmem:[%s6491_s1 + $0x7f4] sm:$0xf0]  ;;  %v3308_v52 = vor.u32 %v4188_v43, %v3307_v40 }
  0x94   :  { %1856 = vmatpush.bf16.msra.mxu3 %v3148_v39  ;;  %v3580_v39 = vor.u32 %v4256_v30, %v3579_v29  ;;  %v3708_v46 = vor.u32 %v4288_v34, %v3707_v33  ;;  %v4220_v47 = vld [vmem:[%s6491_s1 + $0x5d4] sm:$0xf0]  ;;  %v3291_v55 = vld [vmem:[%s6491_s1 + $0x4a8] sm:$0xf] }
  0x95   :  { %1818 = vmatpush.bf16.msra.mxu0 %v2748_v48  ;;  %v3563_v48 = vld [vmem:[%s6491_s1 + $0x6c8] sm:$0xf]  ;;  %v4284_v51 = vld [vmem:[%s6491_s1 + $0x7d4] sm:$0xf0]  ;;  %v3436_v53 = vor.u32 %v4220_v47, %v3435_v45 }
  0x96   :  { %v4184_v56 = vld [vmem:[%s6491_s1 + $0x4b4] sm:$0xf0]  ;;  %v3419_v57 = vld [vmem:[%s6491_s1 + $0x5a8] sm:$0xf] }
  0x97   :  { %1831 = vmatpush.bf16.msra.mxu1 %v2876_v49  ;;  %1844 = vmatpush.bf16.msra.mxu2 %v3004_v50  ;;  %v4252_v49 = vld [vmem:[%s6491_s1 + $0x6d4] sm:$0xf0]  ;;  %v3691_v50 = vld [vmem:[%s6491_s1 + $0x7c8] sm:$0xf]  ;;  %v3292_v0 = vor.u32 %v4184_v56, %v3291_v55 }
  0x98   :  { %1857 = vmatpush.bf16.msra.mxu3 %v3132_v54  ;;  %v3564_v54 = vor.u32 %v4252_v49, %v3563_v48  ;;  %v3692_v58 = vor.u32 %v4284_v51, %v3691_v50  ;;  %v4216_v59 = vld [vmem:[%s6491_s1 + $0x5b4] sm:$0xf0]  ;;  %v3275_v3 = vld [vmem:[%s6491_s1 + $0x488] sm:$0xf] }
  0x99   :  { %1819 = vmatpush.bf16.msra.mxu0 %v2732_v60  ;;  %v3547_v60 = vld [vmem:[%s6491_s1 + $0x6a8] sm:$0xf]  ;;  %v4280_v63 = vld [vmem:[%s6491_s1 + $0x7b4] sm:$0xf0]  ;;  %v3420_v1 = vor.u32 %v4216_v59, %v3419_v57 }
  0x9a   :  { %v4180_v4 = vld [vmem:[%s6491_s1 + $0x494] sm:$0xf0]  ;;  %v3403_v5 = vld [vmem:[%s6491_s1 + $0x588] sm:$0xf] }
  0x9b   :  { %1832 = vmatpush.bf16.msra.mxu1 %v2860_v61  ;;  %1845 = vmatpush.bf16.msra.mxu2 %v2988_v62  ;;  %v4248_v61 = vld [vmem:[%s6491_s1 + $0x6b4] sm:$0xf0]  ;;  %v3675_v62 = vld [vmem:[%s6491_s1 + $0x7a8] sm:$0xf] }
  0x9c   :  { %1858 = vmatpush.bf16.msra.mxu3 %v3116_v2  ;;  %v3548_v2 = vor.u32 %v4248_v61, %v3547_v60  ;;  %v3676_v6 = vor.u32 %v4280_v63, %v3675_v62  ;;  %v4212_v7 = vld [vmem:[%s6491_s1 + $0x594] sm:$0xf0]  ;;  %v3659_v10 = vld [vmem:[%s6491_s1 + $0x788] sm:$0xf] }
  0x9d   :  { %1820 = vmatpush.bf16.msra.mxu0 %v2716_v8  ;;  %v3531_v8 = vld [vmem:[%s6491_s1 + $0x688] sm:$0xf]  ;;  %v4244_v9 = vld [vmem:[%s6491_s1 + $0x694] sm:$0xf0]  ;;  %v3404_v14 = vor.u32 %v4212_v7, %v3403_v5 }
  0x9e   :  { %v3259_v13 = vld [vmem:[%s6491_s1 + $0x468] sm:$0xf]  ;;  %v3532_v15 = vor.u32 %v4244_v9, %v3531_v8  ;;  %v4208_v21 = vld [vmem:[%s6491_s1 + $0x574] sm:$0xf0] }
  0x9f   :  { %1833 = vmatpush.bf16.msra.mxu1 %v2844_v11  ;;  %1846 = vmatpush.bf16.msra.mxu2 %v2972_v12  ;;  %v4276_v11 = vld [vmem:[%s6491_s1 + $0x794] sm:$0xf0]  ;;  %v3276_v12 = vor.u32 %v4180_v4, %v3275_v3  ;;  %v3387_v17 = vld [vmem:[%s6491_s1 + $0x568] sm:$0xf] }
  0xa0   :  { %1859 = vmatpush.bf16.msra.mxu3 %v3100_v16  ;;  %v4176_v16 = vld [vmem:[%s6491_s1 + $0x474] sm:$0xf0]  ;;  %v3660_v23 = vor.u32 %v4276_v11, %v3659_v10  ;;  %v3515_v24 = vld [vmem:[%s6491_s1 + $0x668] sm:$0xf] }
  0xa1   :  { %1821 = vmatpush.bf16.msra.mxu0 %v2700_v27  ;;  %v4240_v25 = vld [vmem:[%s6491_s1 + $0x674] sm:$0xf0]  ;;  %v3643_v27 = vld [vmem:[%s6491_s1 + $0x768] sm:$0xf]  ;;  %v3260_v29 = vor.u32 %v4176_v16, %v3259_v13  ;;  %v4062_v13 = vld [vmem:[%s6491_s1 + $0xec] sm:$0xf] }
  0xa2   :  { %v4272_v28 = vld [vmem:[%s6491_s1 + $0x774] sm:$0xf0]  ;;  %v3243_v30 = vld [vmem:[%s6491_s1 + $0x448] sm:$0xf] }
  0xa3   :  { %1834 = vmatpush.bf16.msra.mxu1 %v2828_v31  ;;  %1847 = vmatpush.bf16.msra.mxu2 %v2956_v32  ;;  %v3388_v31 = vor.u32 %v4208_v21, %v3387_v17  ;;  %v3516_v32 = vor.u32 %v4240_v25, %v3515_v24  ;;  %v4172_v33 = vld [vmem:[%s6491_s1 + $0x454] sm:$0xf0]  ;;  %v3371_v34 = vld [vmem:[%s6491_s1 + $0x548] sm:$0xf]  ;;  %v2941_v17 = vld [vmem:[%s6491_s1 + $0x1f8] sm:$0xf0] }
  0xa4   :  { %1860 = vmatpush.bf16.msra.mxu3 %v3084_v35  ;;  %1822 = vmatmul.bf16.vlgmr.msra.gmra.mxu0 %v4707_v19  ;;  %v290_v35 = vperm.slane %v5536_v26, 0  ;;  %v4236_v40 = vld [vmem:[%s6491_s1 + $0x654] sm:$0xf0]  ;;  %v3627_v43 = vld [vmem:[%s6491_s1 + $0x748] sm:$0xf] }
  0xa5   :  { %1866 = vmatpush.bf16.msrb.mxu0 %v3324_v36  ;;  %v3644_v36 = vor.u32 %v4272_v28, %v3643_v27  ;;  %v4268_v45 = vld [vmem:[%s6491_s1 + $0x754] sm:$0xf0]  ;;  %v3227_v50 = vld [vmem:[%s6491_s1 + $0x428] sm:$0xf]  ;;  %v4126_v21 = vld [vmem:[%s6491_s1 + $0x2ec] sm:$0xf] }
  0xa6   :  { %1848 = vmatmul.bf16.vlgmr.msra.gmra.mxu2 %v4705_v18  ;;  %1835 = vmatmul.bf16.vlgmr.msra.gmra.mxu1 %v4711_v22  ;;  %v4168_v51 = vld [vmem:[%s6491_s1 + $0x434] sm:$0xf0]  ;;  %v3628_v55 = vor.u32 %v4268_v45, %v3627_v43  ;;  %v3483_v57 = vld [vmem:[%s6491_s1 + $0x628] sm:$0xf]  ;;  %v2925_v43 = vld [vmem:[%s6491_s1 + $0x1d8] sm:$0xf0] }
  0xa7   :  { %1879 = vmatpush.bf16.msrb.mxu1 %v3452_v37  ;;  %1892 = vmatpush.bf16.msrb.mxu2 %v3580_v39  ;;  %v4204_v37 = vld [vmem:[%s6491_s1 + $0x554] sm:$0xf0]  ;;  %v3499_v39 = vld [vmem:[%s6491_s1 + $0x648] sm:$0xf]  ;;  %v3228_v62 = vor.u32 %v4168_v51, %v3227_v50  ;;  %v4122_v45 = vld [vmem:[%s6491_s1 + $0x2cc] sm:$0xf] }
  0xa8   :  { %1905 = vmatpush.bf16.msrb.mxu3 %v3708_v46  ;;  %v3244_v46 = vor.u32 %v4172_v33, %v3243_v30  ;;  %v3372_v48 = vor.u32 %v4204_v37, %v3371_v34  ;;  %v3500_v49 = vor.u32 %v4236_v40, %v3499_v39  ;;  %v4200_v56 = vld [vmem:[%s6491_s1 + $0x534] sm:$0xf0]  ;;  %v3611_v59 = vld [vmem:[%s6491_s1 + $0x728] sm:$0xf]  ;;  %v3197_v30 = vld [vmem:[%s6491_s1 + $0x3f8] sm:$0xf0] }
  0xa9   :  { %1861 = vmatmul.bf16.vlgmr.msra.gmra.mxu3 %v4709_v20  ;;  %1867 = vmatpush.bf16.msrb.mxu0 %v3308_v52  ;;  %v3355_v52 = vld [vmem:[%s6491_s1 + $0x528] sm:$0xf]  ;;  %v4264_v60 = vld [vmem:[%s6491_s1 + $0x734] sm:$0xf0]  ;;  %v2797_v37 = vld [vmem:[%s6491_s1 + $0xd8] sm:$0xf0] }
  0xaa   :  { %v3211_v63 = vld [vmem:[%s6491_s1 + $0x408] sm:$0xf]  ;;  %v4196_v4 = vld [vmem:[%s6491_s1 + $0x514] sm:$0xf0]  ;;  %v3612_v7 = vor.u32 %v4264_v60, %v3611_v59  ;;  %v4090_v39 = vld [vmem:[%s6491_s1 + $0x1cc] sm:$0xf] }
  0xab   :  { %1880 = vmatpush.bf16.msrb.mxu1 %v3436_v53  ;;  %1893 = vmatpush.bf16.msrb.mxu2 %v3564_v54  ;;  %v3339_v3 = vld [vmem:[%s6491_s1 + $0x508] sm:$0xf]  ;;  %v4228_v8 = vld [vmem:[%s6491_s1 + $0x614] sm:$0xf0]  ;;  %v4118_v59 = vld [vmem:[%s6491_s1 + $0x2ac] sm:$0xf] }
  0xac   :  { %1906 = vmatpush.bf16.msrb.mxu3 %v3692_v58  ;;  %v4232_v58 = vld [vmem:[%s6491_s1 + $0x634] sm:$0xf0]  ;;  %v3467_v5 = vld [vmem:[%s6491_s1 + $0x608] sm:$0xf]  ;;  %v3340_v27 = vor.u32 %v4196_v4, %v3339_v3  ;;  %v3037_v60 = vld [vmem:[%s6491_s1 + $0x2b8] sm:$0xf0] }
  0xad   :  { %1868 = vmatpush.bf16.msrb.mxu0 %v3292_v0  ;;  %v4164_v0 = vld [vmem:[%s6491_s1 + $0x414] sm:$0xf0]  ;;  %v3595_v9 = vld [vmem:[%s6491_s1 + $0x708] sm:$0xf]  ;;  %v3468_v28 = vor.u32 %v4228_v8, %v3467_v5  ;;  %v2765_v3 = vld [vmem:[%s6491_s1 + $0x98] sm:$0xf0] }
  0xae   :  { %v4260_v10 = vld [vmem:[%s6491_s1 + $0x714] sm:$0xf0]  ;;  %v3212_v16 = vor.u32 %v4164_v0, %v3211_v63  ;;  %v4082_v4 = vld [vmem:[%s6491_s1 + $0x18c] sm:$0xf]  ;;  %v3021_v8 = vld [vmem:[%s6491_s1 + $0x298] sm:$0xf0] }
  0xaf   :  { %1881 = vmatpush.bf16.msrb.mxu1 %v3420_v1  ;;  %1894 = vmatpush.bf16.msrb.mxu2 %v3548_v2  ;;  %v1615_v47 = vpop.f32.mrf.mxu0  ;;  %v1628_v54 = vpop.f32.mrf.mxu1  ;;  %v3356_v1 = vor.u32 %v4200_v56, %v3355_v52  ;;  %v3484_v2 = vor.u32 %v4232_v58, %v3483_v57  ;;  %v2928_v52 = vor.u32 %v4090_v39, %v2925_v43  ;;  %v4086_v56 = vld [vmem:[%s6491_s1 + $0x1ac] sm:$0xf]  ;;  %v2909_v58 = vld [vmem:[%s6491_s1 + $0x1b8] sm:$0xf0] }
  0xb0   :  { %1907 = vmatpush.bf16.msrb.mxu3 %v3676_v6  ;;  %v1616_v53 = vadd.f32 %v1615_v47, %v290_v35  ;;  %v1641_v6 = vpop.f32.mrf.mxu2  ;;  %v4154_v47 = vld [vmem:[%s6491_s1 + $0x3cc] sm:$0xf]  ;;  %v2912_v0 = vor.u32 %v4086_v56, %v2909_v58  ;;  %v2861_v43 = vld [vmem:[%s6491_s1 + $0x158] sm:$0xf0] }
  0xb1   :  { %1869 = vmatpush.bf16.msrb.mxu0 %v3276_v12  ;;  %v1654_v12 = vpop.f32.mrf.mxu3  ;;  %v4038_v56 = vld [vmem:[%s6491_s1 + $0x2c] sm:$0xf] }
  0xb2   :  { %v1629_v61 = vadd.f32 %v1628_v54, %v1616_v53  ;;  %v4054_v54 = vld [vmem:[%s6491_s1 + $0xac] sm:$0xf] }
  0xb3   :  { %1882 = vmatpush.bf16.msrb.mxu1 %v3404_v14  ;;  %1895 = vmatpush.bf16.msrb.mxu2 %v3532_v15  ;;  %v2813_v14 = vld [vmem:[%s6491_s1 + $0xf8] sm:$0xf0]  ;;  %v4094_v15 = vld [vmem:[%s6491_s1 + $0x1ec] sm:$0xf] }
  0xb4   :  { %1908 = vmatpush.bf16.msrb.mxu3 %v3660_v23  ;;  %v1642_v11 = vadd.f32 %v1641_v6, %v1629_v61  ;;  %v3069_v23 = vld [vmem:[%s6491_s1 + $0x2f8] sm:$0xf0]  ;;  %v2816_v33 = vor.u32 %v4062_v13, %v2813_v14  ;;  %v2944_v34 = vor.u32 %v4094_v15, %v2941_v17  ;;  %v4150_v61 = vld [vmem:[%s6491_s1 + $0x3ac] sm:$0xf] }
  0xb5   :  { %1870 = vmatpush.bf16.msrb.mxu0 %v3260_v29  ;;  %v4158_v29 = vld [vmem:[%s6491_s1 + $0x3ec] sm:$0xf]  ;;  %v3072_v35 = vor.u32 %v4126_v21, %v3069_v23  ;;  %v2893_v6 = vld [vmem:[%s6491_s1 + $0x198] sm:$0xf0] }
  0xb6   :  { %v5635_v24 = vadd.f32 %v1654_v12, %v1642_v11  ;;  %v3200_v40 = vor.u32 %v4158_v29, %v3197_v30  ;;  %v2896_v13 = vor.u32 %v4082_v4, %v2893_v6  ;;  %v4046_v15 = vld [vmem:[%s6491_s1 + $0x6c] sm:$0xf]  ;;  %v3005_v29 = vld [vmem:[%s6491_s1 + $0x278] sm:$0xf0] }
  0xb7   :  { %1883 = vmatpush.bf16.msrb.mxu1 %v3388_v31  ;;  %1896 = vmatpush.bf16.msrb.mxu2 %v3516_v32  ;;  %v1617_v25 = vpop.f32.mrf.mxu0  ;;  %v1630_v31 = vpop.f32.mrf.mxu1  ;;  %v3596_v32 = vor.u32 %v4260_v10, %v3595_v9  ;;  %v4146_v9 = vld [vmem:[%s6491_s1 + $0x38c] sm:$0xf]  ;;  %v3149_v10 = vld [vmem:[%s6491_s1 + $0x398] sm:$0xf0] }
  0xb8   :  { %1909 = vmatpush.bf16.msrb.mxu3 %v3644_v36  ;;  %v4058_v36 = vld [vmem:[%s6491_s1 + $0xcc] sm:$0xf]  ;;  %v3152_v25 = vor.u32 %v4146_v9, %v3149_v10  ;;  %v2701_v4 = vld [vmem:[%s6491_s1 + $0x18] sm:$0xf0] }
  0xb9   :  { %1871 = vmatpush.bf16.msrb.mxu0 %v3244_v46  ;;  %v3053_v46 = vld [vmem:[%s6491_s1 + $0x2d8] sm:$0xf0]  ;;  %v2800_v50 = vor.u32 %v4058_v36, %v2797_v37  ;;  %v1656_v51 = vpop.f32.mrf.mxu3  ;;  %v4078_v17 = vld [vmem:[%s6491_s1 + $0x16c] sm:$0xf] }
  0xba   :  { %v3056_v53 = vor.u32 %v4122_v45, %v3053_v46  ;;  %v4142_v30 = vld [vmem:[%s6491_s1 + $0x36c] sm:$0xf]  ;;  %v2733_v36 = vld [vmem:[%s6491_s1 + $0x58] sm:$0xf0] }
  0xbb   :  { %1884 = vmatpush.bf16.msrb.mxu1 %v3372_v48  ;;  %1897 = vmatpush.bf16.msrb.mxu2 %v3500_v49  ;;  %v3181_v48 = vld [vmem:[%s6491_s1 + $0x3d8] sm:$0xf0]  ;;  %v1643_v49 = vpop.f32.mrf.mxu2  ;;  %v4074_v37 = vld [vmem:[%s6491_s1 + $0x14c] sm:$0xf] }
  0xbc   :  { %1910 = vmatpush.bf16.msrb.mxu3 %v3628_v55  ;;  %v2781_v55 = vld [vmem:[%s6491_s1 + $0xb8] sm:$0xf0]  ;;  %v3184_v57 = vor.u32 %v4154_v47, %v3181_v48  ;;  %v4106_v45 = vld [vmem:[%s6491_s1 + $0x24c] sm:$0xf] }
  0xbd   :  { %1872 = vmatpush.bf16.msrb.mxu0 %v3228_v62  ;;  %v3165_v62 = vld [vmem:[%s6491_s1 + $0x3b8] sm:$0xf0]  ;;  %v2784_v63 = vor.u32 %v4054_v54, %v2781_v55  ;;  %v4138_v49 = vld [vmem:[%s6491_s1 + $0x34c] sm:$0xf]  ;;  %v2864_v54 = vor.u32 %v4074_v37, %v2861_v43 }
  0xbe   :  { %v3168_v5 = vor.u32 %v4150_v61, %v3165_v62  ;;  %v2989_v46 = vld [vmem:[%s6491_s1 + $0x258] sm:$0xf0]  ;;  %v4070_v58 = vld [vmem:[%s6491_s1 + $0x12c] sm:$0xf] }
  0xbf   :  { %1885 = vmatpush.bf16.msrb.mxu1 %v3356_v1  ;;  %1898 = vmatpush.bf16.msrb.mxu2 %v3484_v2  ;;  %v3040_v1 = vor.u32 %v4118_v59, %v3037_v60  ;;  %v4050_v2 = vld [vmem:[%s6491_s1 + $0x8c] sm:$0xf]  ;;  %v2992_v55 = vor.u32 %v4106_v45, %v2989_v46  ;;  %v2845_v61 = vld [vmem:[%s6491_s1 + $0x138] sm:$0xf0] }
  0xc0   :  { %1911 = vmatpush.bf16.msrb.mxu3 %v3612_v7  ;;  %v4114_v7 = vld [vmem:[%s6491_s1 + $0x28c] sm:$0xf]  ;;  %v2768_v11 = vor.u32 %v4050_v2, %v2765_v3  ;;  %v3309_v37 = vld [vmem:[%s6491_s1 + $0x4d8] sm:$0xf0] }
  0xc1   :  { %1873 = vmatpush.bf16.msrb.mxu0 %v3212_v16  ;;  %v3024_v14 = vor.u32 %v4114_v7, %v3021_v8  ;;  %v2749_v16 = vld [vmem:[%s6491_s1 + $0x78] sm:$0xf0]  ;;  %v4102_v62 = vld [vmem:[%s6491_s1 + $0x22c] sm:$0xf] }
  0xc2   :  { %v4034_v3 = vld [vmem:[%s6491_s1 + $0xc] sm:$0xf]  ;;  %v2829_v8 = vld [vmem:[%s6491_s1 + $0x118] sm:$0xf0] }
  0xc3   :  { %1886 = vmatpush.bf16.msrb.mxu1 %v3340_v27  ;;  %1899 = vmatpush.bf16.msrb.mxu2 %v3468_v28  ;;  %v1667_v12 = vpop.f32.mrf.mxu0  ;;  %v2877_v27 = vld [vmem:[%s6491_s1 + $0x178] sm:$0xf0]  ;;  %v4110_v28 = vld [vmem:[%s6491_s1 + $0x26c] sm:$0xf] }
  0xc4   :  { %1912 = vmatpush.bf16.msrb.mxu3 %v3596_v32  ;;  %1874 = vmatmul.bf16.vlgmr.msrb.gmra.mxu0 %v4869_v41  ;;  %v1668_v21 = vadd.f32 %v1667_v12, %v5635_v24  ;;  %v3133_v24 = vld [vmem:[%s6491_s1 + $0x378] sm:$0xf0]  ;;  %v2752_v32 = vor.u32 %v4046_v15, %v2749_v16  ;;  %v4066_v7 = vld [vmem:[%s6491_s1 + $0x10c] sm:$0xf] }
  0xc5   :  { %1918 = vmatpush.bf16.msra.mxu0 %v2816_v33  ;;  %v1680_v23 = vpop.f32.mrf.mxu1  ;;  %v2880_v33 = vor.u32 %v4078_v17, %v2877_v27  ;;  %v4098_v9 = vld [vmem:[%s6491_s1 + $0x20c] sm:$0xf]  ;;  %v2957_v12 = vld [vmem:[%s6491_s1 + $0x218] sm:$0xf0] }
  0xc6   :  { %1900 = vmatmul.bf16.vlgmr.msrb.gmra.mxu2 %v4861_v38  ;;  %1887 = vmatmul.bf16.vlgmr.msrb.gmra.mxu1 %v4873_v44  ;;  %v1681_v31 = vadd.f32 %v1680_v23, %v1668_v21  ;;  %v4190_v16 = vld [vmem:[%s6491_s1 + $0x4ec] sm:$0xf]  ;;  %v3325_v17 = vld [vmem:[%s6491_s1 + $0x4f8] sm:$0xf0]  ;;  %v2704_v23 = vor.u32 %v4034_v3, %v2701_v4 }
  0xc7   :  { %1931 = vmatpush.bf16.msra.mxu1 %v2944_v34  ;;  %1944 = vmatpush.bf16.msra.mxu2 %v3072_v35  ;;  %v3008_v34 = vor.u32 %v4110_v28, %v3005_v29  ;;  %v4042_v35 = vld [vmem:[%s6491_s1 + $0x4c] sm:$0xf]  ;;  %v3581_v28 = vld [vmem:[%s6491_s1 + $0x6f8] sm:$0xf0]  ;;  %v2832_v29 = vor.u32 %v4066_v7, %v2829_v8 }
  0xc8   :  { %1957 = vmatpush.bf16.msra.mxu3 %v3200_v40  ;;  %v3136_v40 = vor.u32 %v4142_v30, %v3133_v24  ;;  %v2736_v51 = vor.u32 %v4042_v35, %v2733_v36  ;;  %v4222_v21 = vld [vmem:[%s6491_s1 + $0x5ec] sm:$0xf]  ;;  %v2960_v30 = vor.u32 %v4098_v9, %v2957_v12  ;;  %v3437_v43 = vld [vmem:[%s6491_s1 + $0x5d8] sm:$0xf0] }
  0xc9   :  { %1913 = vmatmul.bf16.vlgmr.msrb.gmra.mxu3 %v4871_v42  ;;  %1919 = vmatpush.bf16.msra.mxu0 %v2800_v50  ;;  %v1693_v39 = vpop.f32.mrf.mxu2  ;;  %v3117_v50 = vld [vmem:[%s6491_s1 + $0x358] sm:$0xf0]  ;;  %v4254_v27 = vld [vmem:[%s6491_s1 + $0x6ec] sm:$0xf] }
  0xca   :  { %v1694_v47 = vadd.f32 %v1693_v39, %v1681_v31  ;;  %v3120_v60 = vor.u32 %v4138_v49, %v3117_v50  ;;  %v4286_v24 = vld [vmem:[%s6491_s1 + $0x7ec] sm:$0xf]  ;;  %v3709_v31 = vld [vmem:[%s6491_s1 + $0x7f8] sm:$0xf0]  ;;  %v3584_v35 = vor.u32 %v4254_v27, %v3581_v28 }
  0xcb   :  { %1932 = vmatpush.bf16.msra.mxu1 %v2928_v52  ;;  %1945 = vmatpush.bf16.msra.mxu2 %v3056_v53  ;;  %v1669_v53 = vpop.f32.mrf.mxu0  ;;  %v4186_v36 = vld [vmem:[%s6491_s1 + $0x4cc] sm:$0xf]  ;;  %v3565_v46 = vld [vmem:[%s6491_s1 + $0x6d8] sm:$0xf0] }
  0xcc   :  { %1958 = vmatpush.bf16.msra.mxu3 %v3184_v57  ;;  %v1706_v48 = vpop.f32.mrf.mxu3  ;;  %v2717_v57 = vld [vmem:[%s6491_s1 + $0x38] sm:$0xf0]  ;;  %v4218_v39 = vld [vmem:[%s6491_s1 + $0x5cc] sm:$0xf]  ;;  %v3312_v49 = vor.u32 %v4186_v36, %v3309_v37 }
  0xcd   :  { %1920 = vmatpush.bf16.msra.mxu0 %v2784_v63  ;;  %v5768_v52 = vadd.f32 %v1706_v48, %v1694_v47  ;;  %v1682_v59 = vpop.f32.mrf.mxu1  ;;  %v2973_v63 = vld [vmem:[%s6491_s1 + $0x238] sm:$0xf0]  ;;  %v2720_v2 = vor.u32 %v4038_v56, %v2717_v57  ;;  %v4250_v45 = vld [vmem:[%s6491_s1 + $0x6cc] sm:$0xf]  ;;  %v3440_v50 = vor.u32 %v4218_v39, %v3437_v43 }
  0xce   :  { %v2976_v6 = vor.u32 %v4102_v62, %v2973_v63  ;;  %v4282_v47 = vld [vmem:[%s6491_s1 + $0x7cc] sm:$0xf]  ;;  %v3693_v48 = vld [vmem:[%s6491_s1 + $0x7d8] sm:$0xf0] }
  0xcf   :  { %1933 = vmatpush.bf16.msra.mxu1 %v2912_v0  ;;  %1946 = vmatpush.bf16.msra.mxu2 %v3040_v1  ;;  %v4134_v0 = vld [vmem:[%s6491_s1 + $0x32c] sm:$0xf]  ;;  %v3101_v1 = vld [vmem:[%s6491_s1 + $0x338] sm:$0xf0]  ;;  %v3696_v56 = vor.u32 %v4282_v47, %v3693_v48 }
  0xd0   :  { %1959 = vmatpush.bf16.msra.mxu3 %v3168_v5  ;;  %v2848_v5 = vor.u32 %v4070_v58, %v2845_v61  ;;  %v4182_v53 = vld [vmem:[%s6491_s1 + $0x4ac] sm:$0xf]  ;;  %v3421_v57 = vld [vmem:[%s6491_s1 + $0x5b8] sm:$0xf0] }
  0xd1   :  { %1921 = vmatpush.bf16.msra.mxu0 %v2768_v11  ;;  %v1695_v10 = vpop.f32.mrf.mxu2  ;;  %v3104_v11 = vor.u32 %v4134_v0, %v3101_v1  ;;  %v4246_v58 = vld [vmem:[%s6491_s1 + $0x6ac] sm:$0xf]  ;;  %v3549_v59 = vld [vmem:[%s6491_s1 + $0x6b8] sm:$0xf0] }
  0xd2   :  { %v3552_v63 = vor.u32 %v4246_v58, %v3549_v59  ;;  %v4178_v0 = vld [vmem:[%s6491_s1 + $0x48c] sm:$0xf]  ;;  %v3277_v1 = vld [vmem:[%s6491_s1 + $0x498] sm:$0xf0]  ;;  %v291_v58 = vperm.slane %v5536_v26, 1 }
  0xd3   :  { %1934 = vmatpush.bf16.msra.mxu1 %v2896_v13  ;;  %1947 = vmatpush.bf16.msra.mxu2 %v3024_v14  ;;  %v4130_v13 = vld [vmem:[%s6491_s1 + $0x30c] sm:$0xf]  ;;  %v3085_v14 = vld [vmem:[%s6491_s1 + $0x318] sm:$0xf0] }
  0xd4   :  { %1960 = vmatpush.bf16.msra.mxu3 %v3152_v25  ;;  %v1708_v15 = vpop.f32.mrf.mxu3  ;;  %v3453_v25 = vld [vmem:[%s6491_s1 + $0x5f8] sm:$0xf0]  ;;  %v4274_v4 = vld [vmem:[%s6491_s1 + $0x78c] sm:$0xf] }
  0xd5   :  { %1922 = vmatpush.bf16.msra.mxu0 %v2752_v32  ;;  %v3088_v32 = vor.u32 %v4130_v13, %v3085_v14  ;;  %v3533_v3 = vld [vmem:[%s6491_s1 + $0x698] sm:$0xf0]  ;;  %v4174_v10 = vld [vmem:[%s6491_s1 + $0x46c] sm:$0xf] }
  0xd6   :  { %v4206_v12 = vld [vmem:[%s6491_s1 + $0x56c] sm:$0xf]  ;;  %v3389_v15 = vld [vmem:[%s6491_s1 + $0x578] sm:$0xf0] }
  0xd7   :  { %1935 = vmatpush.bf16.msra.mxu1 %v2880_v33  ;;  %1948 = vmatpush.bf16.msra.mxu2 %v3008_v34  ;;  %v3328_v33 = vor.u32 %v4190_v16, %v3325_v17  ;;  %v3456_v34 = vor.u32 %v4222_v21, %v3453_v25  ;;  %v4238_v16 = vld [vmem:[%s6491_s1 + $0x66c] sm:$0xf]  ;;  %v3517_v17 = vld [vmem:[%s6491_s1 + $0x678] sm:$0xf0]  ;;  %v3392_v27 = vor.u32 %v4206_v12, %v3389_v15 }
  0xd8   :  { %1961 = vmatpush.bf16.msra.mxu3 %v3136_v40  ;;  %v3712_v40 = vor.u32 %v4286_v24, %v3709_v31  ;;  %v4270_v21 = vld [vmem:[%s6491_s1 + $0x76c] sm:$0xf]  ;;  %v3520_v28 = vor.u32 %v4238_v16, %v3517_v17  ;;  %v3629_v39 = vld [vmem:[%s6491_s1 + $0x758] sm:$0xf0]  ;;  %v3763_v17 = vld [vmem:[%s6494_s3 + $0x60] sm:$0xf] }
  0xd9   :  { %1923 = vmatpush.bf16.msra.mxu0 %v2736_v51  ;;  %v3568_v51 = vor.u32 %v4250_v45, %v3565_v46  ;;  %v4202_v24 = vld [vmem:[%s6491_s1 + $0x54c] sm:$0xf]  ;;  %v3229_v48 = vld [vmem:[%s6491_s1 + $0x438] sm:$0xf0] }
  0xda   :  { %v4266_v37 = vld [vmem:[%s6491_s1 + $0x74c] sm:$0xf]  ;;  %v3341_v26 = vld [vmem:[%s6491_s1 + $0x518] sm:$0xf0] }
  0xdb   :  { %1936 = vmatpush.bf16.msra.mxu1 %v2864_v54  ;;  %1949 = vmatpush.bf16.msra.mxu2 %v2992_v55  ;;  %v3293_v54 = vld [vmem:[%s6491_s1 + $0x4b8] sm:$0xf0]  ;;  %v4214_v55 = vld [vmem:[%s6491_s1 + $0x5ac] sm:$0xf] }
  0xdc   :  { %1962 = vmatpush.bf16.msra.mxu3 %v3120_v60  ;;  %v4278_v60 = vld [vmem:[%s6491_s1 + $0x7ac] sm:$0xf]  ;;  %v3296_v61 = vor.u32 %v4182_v53, %v3293_v54  ;;  %v3424_v62 = vor.u32 %v4214_v55, %v3421_v57  ;;  %v3357_v53 = vld [vmem:[%s6491_s1 + $0x538] sm:$0xf0] }
  0xdd   :  { %1924 = vmatpush.bf16.msra.mxu0 %v2720_v2  ;;  %v4242_v2 = vld [vmem:[%s6491_s1 + $0x68c] sm:$0xf]  ;;  %v3485_v55 = vld [vmem:[%s6491_s1 + $0x638] sm:$0xf0] }
  0xde   :  { %v3536_v9 = vor.u32 %v4242_v2, %v3533_v3  ;;  %v4166_v47 = vld [vmem:[%s6491_s1 + $0x42c] sm:$0xf]  ;;  %v3613_v57 = vld [vmem:[%s6491_s1 + $0x738] sm:$0xf0] }
  0xdf   :  { %1937 = vmatpush.bf16.msra.mxu1 %v2848_v5  ;;  %1950 = vmatpush.bf16.msra.mxu2 %v2976_v6  ;;  %v3661_v5 = vld [vmem:[%s6491_s1 + $0x798] sm:$0xf0]  ;;  %v3280_v6 = vor.u32 %v4178_v0, %v3277_v1  ;;  %v4230_v54 = vld [vmem:[%s6491_s1 + $0x62c] sm:$0xf]  ;;  %v3232_v59 = vor.u32 %v4166_v47, %v3229_v48  ;;  %v3803_v47 = vld [vmem:[%s6494_s3 + $0xb0] sm:$0xf] }
  0xe0   :  { %1963 = vmatpush.bf16.msra.mxu3 %v3104_v11  ;;  %v3261_v11 = vld [vmem:[%s6491_s1 + $0x478] sm:$0xf0]  ;;  %v3664_v14 = vor.u32 %v4274_v4, %v3661_v5  ;;  %v3771_v4 = vld [vmem:[%s6494_s3 + $0x70] sm:$0xf]  ;;  %v4304_v5 = vld [vmem:[%s6494_s3 + $0x74] sm:$0xf0] }
  0xe1   :  { %1925 = vmatpush.bf16.msra.mxu0 %v2704_v23  ;;  %v5918_v7 = vpop.f32.mrf.mxu0  ;;  %v3645_v23 = vld [vmem:[%s6491_s1 + $0x778] sm:$0xf0]  ;;  %v3264_v25 = vor.u32 %v4174_v10, %v3261_v11  ;;  %v4320_v10 = vld [vmem:[%s6494_s3 + $0xf4] sm:$0xf0]  ;;  %v3772_v15 = vor.u32 %v4304_v5, %v3771_v4  ;;  %v3787_v4 = vld [vmem:[%s6494_s3 + $0x90] sm:$0xf] }
  0xe2   :  { %v3597_v3 = vld [vmem:[%s6491_s1 + $0x718] sm:$0xf0] }
  0xe3   :  { %1938 = vmatpush.bf16.msra.mxu1 %v2832_v29  ;;  %1951 = vmatpush.bf16.msra.mxu2 %v2960_v30  ;;  %v5929_v13 = vpop.f32.mrf.mxu1  ;;  %v4170_v29 = vld [vmem:[%s6491_s1 + $0x44c] sm:$0xf]  ;;  %v3245_v30 = vld [vmem:[%s6491_s1 + $0x458] sm:$0xf0] }
  0xe4   :  { %1964 = vmatpush.bf16.msra.mxu3 %v3088_v32  ;;  %1926 = vmatmul.bf16.vlgmr.msra.gmra.mxu0 %v4707_v19  ;;  %v4210_v19 = vld [vmem:[%s6491_s1 + $0x58c] sm:$0xf]  ;;  %v3648_v32 = vor.u32 %v4270_v21, %v3645_v23  ;;  %v4302_v21 = vld [vmem:[%s6494_s3 + $0x64] sm:$0xf0]  ;;  %v3827_v23 = vld [vmem:[%s6494_s3 + $0xe0] sm:$0xf] }
  0xe5   :  { %1970 = vmatpush.bf16.msrb.mxu0 %v3328_v33  ;;  %v3373_v33 = vld [vmem:[%s6491_s1 + $0x558] sm:$0xf0] }
  0xe6   :  { %1952 = vmatmul.bf16.vlgmr.msra.gmra.mxu2 %v4705_v18  ;;  %v3677_v18 = vld [vmem:[%s6491_s1 + $0x7b8] sm:$0xf0]  ;;  %1939 = vmatmul.bf16.vlgmr.msra.gmra.mxu1 %v4711_v22  ;;  %v3376_v45 = vor.u32 %v4202_v24, %v3373_v33  ;;  %v3819_v24 = vld [vmem:[%s6494_s3 + $0xd0] sm:$0xf] }
  0xe7   :  { %1983 = vmatpush.bf16.msrb.mxu1 %v3456_v34  ;;  %1996 = vmatpush.bf16.msrb.mxu2 %v3584_v35  ;;  %v3405_v22 = vld [vmem:[%s6491_s1 + $0x598] sm:$0xf0]  ;;  %v4234_v34 = vld [vmem:[%s6491_s1 + $0x64c] sm:$0xf] }
  0xe8   :  { %2009 = vmatpush.bf16.msrb.mxu3 %v3712_v40  ;;  %v3408_v8 = vor.u32 %v4210_v19, %v3405_v22  ;;  %v3501_v35 = vld [vmem:[%s6491_s1 + $0x658] sm:$0xf0]  ;;  %v3248_v40 = vor.u32 %v4170_v29, %v3245_v30  ;;  %v4226_v19 = vld [vmem:[%s6491_s1 + $0x60c] sm:$0xf]  ;;  %v3755_v29 = vld [vmem:[%s6494_s3 + $0x50] sm:$0xf] }
  0xe9   :  { %1965 = vmatmul.bf16.vlgmr.msra.gmra.mxu3 %v4709_v20  ;;  %1971 = vmatpush.bf16.msrb.mxu0 %v3312_v49  ;;  %v3680_v20 = vor.u32 %v4278_v60, %v3677_v18  ;;  %v5955_v31 = vpop.f32.mrf.mxu2  ;;  %v1721_v43 = vpop.f32.mrf.mxu0  ;;  %v3504_v46 = vor.u32 %v4234_v34, %v3501_v35  ;;  %v4198_v49 = vld [vmem:[%s6491_s1 + $0x52c] sm:$0xf]  ;;  %v4300_v30 = vld [vmem:[%s6494_s3 + $0x54] sm:$0xf0]  ;;  %v3811_v34 = vld [vmem:[%s6494_s3 + $0xc0] sm:$0xf] }
  0xea   :  { %v4162_v60 = vld [vmem:[%s6491_s1 + $0x40c] sm:$0xf]  ;;  %v3360_v18 = vor.u32 %v4198_v49, %v3357_v53  ;;  %v3899_v35 = vld [vmem:[%s6494_s3 + $0x170] sm:$0xf]  ;;  %v4334_v53 = vld [vmem:[%s6494_s3 + $0x164] sm:$0xf0] }
  0xeb   :  { %1984 = vmatpush.bf16.msrb.mxu1 %v3440_v50  ;;  %1997 = vmatpush.bf16.msrb.mxu2 %v3568_v51  ;;  %v1734_v50 = vpop.f32.mrf.mxu1  ;;  %v3632_v51 = vor.u32 %v4266_v37, %v3629_v39  ;;  %v4258_v22 = vld [vmem:[%s6491_s1 + $0x70c] sm:$0xf] }
  0xec   :  { %2010 = vmatpush.bf16.msrb.mxu3 %v3696_v56  ;;  %v5966_v36 = vpop.f32.mrf.mxu3  ;;  %v4262_v56 = vld [vmem:[%s6491_s1 + $0x72c] sm:$0xf]  ;;  %v4312_v50 = vld [vmem:[%s6494_s3 + $0xb4] sm:$0xf0] }
  0xed   :  { %1972 = vmatpush.bf16.msrb.mxu0 %v3296_v61  ;;  %v3488_v61 = vor.u32 %v4230_v54, %v3485_v55  ;;  %v3616_v1 = vor.u32 %v4262_v56, %v3613_v57  ;;  %v3804_v57 = vor.u32 %v4312_v50, %v3803_v47  ;;  %v4324_v47 = vld [vmem:[%s6494_s3 + $0x114] sm:$0xf0]  ;;  %v3757_v50 = vld [vmem:[%s6494_s3 + $0x58] sm:$0xf0] }
  0xef   :  { %1985 = vmatpush.bf16.msrb.mxu1 %v3424_v62  ;;  %1998 = vmatpush.bf16.msrb.mxu2 %v3552_v63  ;;  %v3213_v62 = vld [vmem:[%s6491_s1 + $0x418] sm:$0xf0]  ;;  %v4194_v63 = vld [vmem:[%s6491_s1 + $0x50c] sm:$0xf] }
  0xf0   :  { %2011 = vmatpush.bf16.msrb.mxu3 %v3680_v20  ;;  %v3469_v20 = vld [vmem:[%s6491_s1 + $0x618] sm:$0xf0]  ;;  %v3344_v11 = vor.u32 %v4194_v63, %v3341_v26  ;;  %v3883_v63 = vld [vmem:[%s6494_s3 + $0x150] sm:$0xf]  ;;  %v4332_v26 = vld [vmem:[%s6494_s3 + $0x154] sm:$0xf0] }
  0xf1   :  { %1973 = vmatpush.bf16.msrb.mxu0 %v3280_v6  ;;  %v1747_v0 = vpop.f32.mrf.mxu2  ;;  %v1720_v6 = vadd.f32 %v5918_v7, %v291_v58  ;;  %v3472_v12 = vor.u32 %v4226_v19, %v3469_v20  ;;  %v3731_v58 = vld [vmem:[%s6494_s3 + $0x20] sm:$0xf] }
  0xf2   :  { %v3884_v0 = vor.u32 %v4332_v26, %v3883_v63  ;;  %v4313_v63 = vld [vmem:[%s6494_s3 + $0xc4] sm:$0xf]  ;;  %v3813_v26 = vld [vmem:[%s6494_s3 + $0xc8] sm:$0xf0] }
  0xf3   :  { %1986 = vmatpush.bf16.msrb.mxu1 %v3408_v8  ;;  %1999 = vmatpush.bf16.msrb.mxu2 %v3536_v9  ;;  %v3216_v8 = vor.u32 %v4162_v60, %v3213_v62  ;;  %v3835_v9 = vld [vmem:[%s6494_s3 + $0xf0] sm:$0xf]  ;;  %v1733_v7 = vadd.f32 %v5929_v13, %v1720_v6  ;;  %v3764_v13 = vor.u32 %v4302_v21, %v3763_v17  ;;  %v3795_v60 = vld [vmem:[%s6494_s3 + $0xa0] sm:$0xf]  ;;  %v4308_v6 = vld [vmem:[%s6494_s3 + $0x94] sm:$0xf0] }
  0xf4   :  { %2012 = vmatpush.bf16.msrb.mxu3 %v3664_v14  ;;  %v1760_v2 = vpop.f32.mrf.mxu3  ;;  %v3600_v14 = vor.u32 %v4258_v22, %v3597_v3  ;;  %v3836_v16 = vor.u32 %v4320_v10, %v3835_v9  ;;  %v4292_v3 = vld [vmem:[%s6494_s3 + $0x14] sm:$0xf0]  ;;  %v4330_v9 = vld [vmem:[%s6494_s3 + $0x144] sm:$0xf0]  ;;  %v4303_v21 = vld [vmem:[%s6494_s3 + $0x74] sm:$0xf] }
  0xf5   :  { %1974 = vmatpush.bf16.msrb.mxu0 %v3264_v25  ;;  %v4318_v25 = vld [vmem:[%s6494_s3 + $0xe4] sm:$0xf0]  ;;  %v3723_v2 = vld [vmem:[%s6494_s3 + $0x10] sm:$0xf] }
  0xf6   :  { %v4306_v17 = vld [vmem:[%s6494_s3 + $0x84] sm:$0xf0] }
  0xf7   :  { %1987 = vmatpush.bf16.msrb.mxu1 %v3392_v27  ;;  %2000 = vmatpush.bf16.msrb.mxu2 %v3520_v28  ;;  %v3828_v27 = vor.u32 %v4318_v25, %v3827_v23  ;;  %v1746_v28 = vadd.f32 %v5955_v31, %v1733_v7  ;;  %v3756_v31 = vor.u32 %v4300_v30, %v3755_v29  ;;  %v3779_v7 = vld [vmem:[%s6494_s3 + $0x80] sm:$0xf]  ;;  %v3773_v25 = vld [vmem:[%s6494_s3 + $0x78] sm:$0xf0]  ;;  %v4319_v29 = vld [vmem:[%s6494_s3 + $0xf4] sm:$0xf] }
  0xf8   :  { %2013 = vmatpush.bf16.msrb.mxu3 %v3648_v32  ;;  %v3837_v30 = vld [vmem:[%s6494_s3 + $0xf8] sm:$0xf0] }
  0xf9   :  { %1975 = vmatpush.bf16.msrb.mxu0 %v3248_v40  ;;  %v1759_v32 = vadd.f32 %v5966_v36, %v1746_v28  ;;  %v4336_v36 = vld [vmem:[%s6494_s3 + $0x174] sm:$0xf0] }
  0xfa   :  { %v3900_v37 = vor.u32 %v4336_v36, %v3899_v35  ;;  %v4328_v28 = vld [vmem:[%s6494_s3 + $0x134] sm:$0xf0]  ;;  %v3859_v35 = vld [vmem:[%s6494_s3 + $0x120] sm:$0xf]  ;;  %v4317_v36 = vld [vmem:[%s6494_s3 + $0xe4] sm:$0xf] }
  0xfb   :  { %1988 = vmatpush.bf16.msrb.mxu1 %v3376_v45  ;;  %2001 = vmatpush.bf16.msrb.mxu2 %v3504_v46  ;;  %v3739_v45 = vld [vmem:[%s6494_s3 + $0x30] sm:$0xf]  ;;  %v4296_v46 = vld [vmem:[%s6494_s3 + $0x34] sm:$0xf0] }
  0xfc   :  { %2014 = vmatpush.bf16.msrb.mxu3 %v3632_v51  ;;  %v3891_v51 = vld [vmem:[%s6494_s3 + $0x160] sm:$0xf]  ;;  %v3740_v55 = vor.u32 %v4296_v46, %v3739_v45  ;;  %v3851_v46 = vld [vmem:[%s6494_s3 + $0x110] sm:$0xf] }
  0xfd   :  { %1976 = vmatpush.bf16.msrb.mxu0 %v3232_v59  ;;  %v3892_v54 = vor.u32 %v4334_v53, %v3891_v51  ;;  %v4294_v59 = vld [vmem:[%s6494_s3 + $0x24] sm:$0xf0]  ;;  %v4315_v51 = vld [vmem:[%s6494_s3 + $0xd4] sm:$0xf]  ;;  %v3852_v53 = vor.u32 %v4324_v47, %v3851_v46  ;;  %v3781_v46 = vld [vmem:[%s6494_s3 + $0x88] sm:$0xf0] }
  0xff   :  { %1989 = vmatpush.bf16.msrb.mxu1 %v3360_v18  ;;  %2002 = vmatpush.bf16.msrb.mxu2 %v3488_v61  ;;  %v4310_v61 = vld [vmem:[%s6494_s3 + $0xa4] sm:$0xf0] }
 0x100   :  { %2015 = vmatpush.bf16.msrb.mxu3 %v3616_v1  ;;  %v3732_v1 = vor.u32 %v4294_v59, %v3731_v58  ;;  %v3796_v22 = vor.u32 %v4310_v61, %v3795_v60  ;;  %v3901_v58 = vld [vmem:[%s6494_s3 + $0x178] sm:$0xf0]  ;;  %v3749_v61 = vld [vmem:[%s6494_s3 + $0x48] sm:$0xf0] }
 0x101   :  { %1977 = vmatpush.bf16.msrb.mxu0 %v3216_v8  ;;  %v1771_v40 = vpop.f32.mrf.mxu0  ;;  %v3875_v8 = vld [vmem:[%s6494_s3 + $0x140] sm:$0xf] }
 0x102   :  { %v1772_v48 = vadd.f32 %v1771_v40, %v1759_v32  ;;  %v3876_v10 = vor.u32 %v4330_v9, %v3875_v8  ;;  %v2022_v32 = vmax.f32 %v5768_v52, 0.0  ;;  %v4326_v52 = vld [vmem:[%s6494_s3 + $0x124] sm:$0xf0]  ;;  %v3893_v8 = vld [vmem:[%s6494_s3 + $0x168] sm:$0xf0] }
 0x103   :  { %1990 = vmatpush.bf16.msrb.mxu1 %v3344_v11  ;;  %2003 = vmatpush.bf16.msrb.mxu2 %v3472_v12  ;;  %v1784_v49 = vpop.f32.mrf.mxu1  ;;  %v3724_v12 = vor.u32 %v4292_v3, %v3723_v2  ;;  %v4311_v2 = vld [vmem:[%s6494_s3 + $0xb4] sm:$0xf] }
 0x104   :  { %2016 = vmatpush.bf16.msrb.mxu3 %v3600_v14  ;;  %1978 = vmatmul.bf16.vlgmr.msrb.gmra.mxu0 %v4869_v41  ;;  %v4316_v41 = vld [vmem:[%s6494_s3 + $0xd4] sm:$0xf0]  ;;  %v1785_v56 = vadd.f32 %v1784_v49, %v1772_v48  ;;  %v3715_v14 = vld [vmem:[%s6494_s3] sm:$0xf]  ;;  %v4299_v49 = vld [vmem:[%s6494_s3 + $0x54] sm:$0xf] }
 0x105   :  { %2419 = vmatpush.bf16.msra.mxu0 %v3772_v15  ;;  %v3820_v33 = vor.u32 %v4316_v41, %v3819_v24  ;;  %v4290_v15 = vld [vmem:[%s6494_s3 + $0x4] sm:$0xf0]  ;;  %v3760_v59 = vor.u32 %v4299_v49, %v3757_v50  ;;  %v4325_v50 = vld [vmem:[%s6494_s3 + $0x124] sm:$0xf] }
 0x106   :  { %1991 = vmatmul.bf16.vlgmr.msrb.gmra.mxu1 %v4873_v44  ;;  %2004 = vmatmul.bf16.vlgmr.msrb.gmra.mxu2 %v4861_v38  ;;  %v3747_v38 = vld [vmem:[%s6494_s3 + $0x40] sm:$0xf]  ;;  %v4298_v44 = vld [vmem:[%s6494_s3 + $0x44] sm:$0xf0] }
 0x107   :  { %2432 = vmatpush.bf16.msra.mxu1 %v3836_v16  ;;  %2017 = vmatmul.bf16.vlgmr.msrb.gmra.mxu3 %v4871_v42  ;;  %v4314_v42 = vld [vmem:[%s6494_s3 + $0xc4] sm:$0xf0]  ;;  %v3748_v39 = vor.u32 %v4298_v44, %v3747_v38  ;;  %v3788_v16 = vor.u32 %v4308_v6, %v3787_v4  ;;  %v3776_v38 = vor.u32 %v4303_v21, %v3773_v25  ;;  %v4301_v44 = vld [vmem:[%s6494_s3 + $0x64] sm:$0xf]  ;;  %v3805_v4 = vld [vmem:[%s6494_s3 + $0xb8] sm:$0xf0] }
 0x108   :  { %v3812_v43 = vor.u32 %v4314_v42, %v3811_v34  ;;  %2445 = vmatpush.bf16.msra.mxu2 %v3900_v37  ;;  %v3840_v34 = vor.u32 %v4319_v29, %v3837_v30  ;;  %v3765_v42 = vld [vmem:[%s6494_s3 + $0x68] sm:$0xf0]  ;;  %v4333_v6 = vld [vmem:[%s6494_s3 + $0x164] sm:$0xf]  ;;  %v3885_v21 = vld [vmem:[%s6494_s3 + $0x158] sm:$0xf0] }
 0x109   :  { %2420 = vmatpush.bf16.msra.mxu0 %v3764_v13  ;;  %v1797_v18 = vpop.f32.mrf.mxu2  ;;  %v1773_v20 = vpop.f32.mrf.mxu0  ;;  %v3829_v37 = vld [vmem:[%s6494_s3 + $0xe8] sm:$0xf0]  ;;  %v3768_v45 = vor.u32 %v4301_v44, %v3765_v42  ;;  %v3896_v9 = vor.u32 %v4333_v6, %v3893_v8  ;;  %v3725_v29 = vld [vmem:[%s6494_s3 + $0x18] sm:$0xf0]  ;;  %v4307_v30 = vld [vmem:[%s6494_s3 + $0x94] sm:$0xf] }
 0x10a   :  { %v1798_v19 = vadd.f32 %v1797_v18, %v1785_v56  ;;  %v3832_v48 = vor.u32 %v4317_v36, %v3829_v37  ;;  %v4322_v56 = vld [vmem:[%s6494_s3 + $0x104] sm:$0xf0]  ;;  %v4297_v18 = vld [vmem:[%s6494_s3 + $0x44] sm:$0xf]  ;;  %v4295_v20 = vld [vmem:[%s6494_s3 + $0x34] sm:$0xf] }
 0x10b   :  { %2433 = vmatpush.bf16.msra.mxu1 %v3828_v27  ;;  %v1786_v5 = vpop.f32.mrf.mxu1  ;;  %v3867_v27 = vld [vmem:[%s6494_s3 + $0x130] sm:$0xf]  ;;  %v3717_v36 = vld [vmem:[%s6494_s3 + $0x8] sm:$0xf0]  ;;  %v4327_v37 = vld [vmem:[%s6494_s3 + $0x134] sm:$0xf] }
 0x10c   :  { %2446 = vmatpush.bf16.msra.mxu2 %v3892_v54  ;;  %v1810_v62 = vpop.f32.mrf.mxu3  ;;  %v3868_v24 = vor.u32 %v4328_v28, %v3867_v27  ;;  %v3821_v54 = vld [vmem:[%s6494_s3 + $0xd8] sm:$0xf0]  ;;  %v4291_v28 = vld [vmem:[%s6494_s3 + $0x14] sm:$0xf] }
 0x10d   :  { %2421 = vmatpush.bf16.msra.mxu0 %v3756_v31  ;;  %v1811_v11 = vadd.f32 %v1810_v62, %v1798_v19  ;;  %v3716_v31 = vor.u32 %v4290_v15, %v3715_v14  ;;  %v3824_v60 = vor.u32 %v4315_v51, %v3821_v54  ;;  %v3816_v19 = vor.u32 %v4313_v63, %v3813_v26  ;;  %v3733_v14 = vld [vmem:[%s6494_s3 + $0x28] sm:$0xf0]  ;;  %v4309_v15 = vld [vmem:[%s6494_s3 + $0xa4] sm:$0xf] }
 0x10e   :  { %v3728_v44 = vor.u32 %v4291_v28, %v3725_v29  ;;  %v3861_v51 = vld [vmem:[%s6494_s3 + $0x128] sm:$0xf0]  ;;  %v4321_v63 = vld [vmem:[%s6494_s3 + $0x104] sm:$0xf]  ;;  %v4342_v28 = vld [vmem:[%s6494_s3 + $0x1a4] sm:$0xf0] }
 0x10f   :  { %2434 = vmatpush.bf16.msra.mxu1 %v3820_v33  ;;  %v2023_v41 = vmax.f32 %v1811_v11, 0.0  ;;  %v3780_v33 = vor.u32 %v4306_v17, %v3779_v7  ;;  %v3808_v11 = vor.u32 %v4311_v2, %v3805_v4  ;;  %v4331_v17 = vld [vmem:[%s6494_s3 + $0x154] sm:$0xf]  ;;  %v3845_v26 = vld [vmem:[%s6494_s3 + $0x108] sm:$0xf0] }
 0x110   :  { %2447 = vmatpush.bf16.msra.mxu2 %v3884_v0  ;;  %v3888_v25 = vor.u32 %v4331_v17, %v3885_v21  ;;  %v3947_v2 = vld [vmem:[%s6494_s3 + $0x1d0] sm:$0xf] }
 0x111   :  { %2422 = vmatpush.bf16.msra.mxu0 %v3748_v39  ;;  %v1799_v23 = vpop.f32.mrf.mxu2  ;;  %v3860_v39 = vor.u32 %v4326_v52, %v3859_v35  ;;  %v6188_v40 = vpack.c.bf16 %v2023_v41, %v2023_v41  ;;  %v3789_v41 = vld [vmem:[%s6494_s3 + $0x98] sm:$0xf0]  ;;  %v4289_v35 = vld [vmem:[%s6494_s3 + $0x4] sm:$0xf] }
 0x112   :  { %v3792_v52 = vor.u32 %v4307_v30, %v3789_v41 }
 0x113   :  { %2435 = vmatpush.bf16.msra.mxu1 %v3812_v43  ;;  %v6190_v43 = vpack.c.bf16 %v2022_v32, %v2022_v32  ;;  %v4329_v32 = vld [vmem:[%s6494_s3 + $0x144] sm:$0xf] }
 0x114   :  { %2448 = vmatpush.bf16.msra.mxu2 %v3876_v10  ;;  %v1812_v13 = vpop.f32.mrf.mxu3 }
 0x115   :  { %2423 = vmatpush.bf16.msra.mxu0 %v3740_v55  ;;  %v3843_v55 = vld [vmem:[%s6494_s3 + $0x100] sm:$0xf] }
 0x116   :  { %v3844_v62 = vor.u32 %v4322_v56, %v3843_v55  ;;  %v3720_v55 = vor.u32 %v4289_v35, %v3717_v36  ;;  %v4352_v56 = vld [vmem:[%s6494_s3 + $0x1f4] sm:$0xf0]  ;;  %v4351_v35 = vld [vmem:[%s6494_s3 + $0x1f4] sm:$0xf] }
 0x117   :  { %2436 = vmatpush.bf16.msra.mxu1 %v3804_v57  ;;  %v4335_v57 = vld [vmem:[%s6494_s3 + $0x174] sm:$0xf] }
 0x118   :  { %2449 = vmatpush.bf16.msra.mxu2 %v3868_v24  ;;  %v3904_v0 = vor.u32 %v4335_v57, %v3901_v58 }
 0x119   :  { %2424 = vmatpush.bf16.msra.mxu0 %v3732_v1  ;;  %v3752_v1 = vor.u32 %v4297_v18, %v3749_v61  ;;  %v3853_v18 = vld [vmem:[%s6494_s3 + $0x118] sm:$0xf0] }
 0x11b   :  { %2437 = vmatpush.bf16.msra.mxu1 %v3796_v22  ;;  %v3741_v22 = vld [vmem:[%s6494_s3 + $0x38] sm:$0xf0] }
 0x11c   :  { %2450 = vmatpush.bf16.msra.mxu2 %v3860_v39  ;;  %v3744_v10 = vor.u32 %v4295_v20, %v3741_v22  ;;  %v3869_v39 = vld [vmem:[%s6494_s3 + $0x138] sm:$0xf0]  ;;  %v3955_v20 = vld [vmem:[%s6494_s3 + $0x1e0] sm:$0xf] }
 0x11d   :  { %2425 = vmatpush.bf16.msra.mxu0 %v3724_v12  ;;  %v4293_v12 = vld [vmem:[%s6494_s3 + $0x24] sm:$0xf] }
 0x11e   :  { %v3736_v13 = vor.u32 %v4293_v12, %v3733_v14 }
 0x11f   :  { %2438 = vmatpush.bf16.msra.mxu1 %v3788_v16  ;;  %v3797_v16 = vld [vmem:[%s6494_s3 + $0xa8] sm:$0xf0] }
 0x120   :  { %2451 = vmatpush.bf16.msra.mxu2 %v3852_v53  ;;  %v3800_v27 = vor.u32 %v4309_v15, %v3797_v16  ;;  %v3963_v53 = vld [vmem:[%s6494_s3 + $0x1f0] sm:$0xf] }
 0x121   :  { %2426 = vmatpush.bf16.msra.mxu0 %v3716_v31  ;;  %v1823_v3 = vpop.f32.mrf.mxu0  ;;  %v3964_v58 = vor.u32 %v4352_v56, %v3963_v53  ;;  %v3931_v16 = vld [vmem:[%s6494_s3 + $0x1b0] sm:$0xf] }
 0x123   :  { %2439 = vmatpush.bf16.msra.mxu1 %v3780_v33  ;;  %v6248_v5 = vpop.f32.mrf.mxu1  ;;  %v3877_v33 = vld [vmem:[%s6494_s3 + $0x148] sm:$0xf0]  ;;  %2458 = vmatpush.bf16.msra.mxu3 %v3964_v58 }
 0x124   :  { %2427 = vmatmul.bf16.vlgmr.msra.gmra.mxu0 %v6190_v43  ;;  %2452 = vmatpush.bf16.msra.mxu2 %v3844_v62 }
 0x125   :  { %2471 = vmatpush.bf16.msrb.mxu0 %v3776_v38  ;;  %v3880_v38 = vor.u32 %v4329_v32, %v3877_v33  ;;  %v4340_v32 = vld [vmem:[%s6494_s3 + $0x194] sm:$0xf0] }
 0x126   :  { %2440 = vmatmul.bf16.vlgmr.msra.gmra.mxu1 %v6188_v40 }
 0x127   :  { %2484 = vmatpush.bf16.msrb.mxu1 %v3840_v34  ;;  %v6295_v34 = vld [vmem:[%s6493_s2] sm:$0xf] }
 0x128   :  { %2497 = vmatpush.bf16.msrb.mxu2 %v3904_v0  ;;  %v292_v42 = vperm.slane %v6295_v34, 2 }
 0x129   :  { %2472 = vmatpush.bf16.msrb.mxu0 %v3768_v45  ;;  %v1849_v7 = vpop.f32.mrf.mxu2  ;;  %v1825_v24 = vpop.f32.mrf.mxu0  ;;  %v4305_v45 = vld [vmem:[%s6494_s3 + $0x84] sm:$0xf] }
 0x12a   :  { %v1824_v54 = vadd.f32 %v1823_v3, %v292_v42  ;;  %v3784_v57 = vor.u32 %v4305_v45, %v3781_v46 }
 0x12b   :  { %2485 = vmatpush.bf16.msrb.mxu1 %v3832_v48  ;;  %v1838_v31 = vpop.f32.mrf.mxu1  ;;  %v3872_v48 = vor.u32 %v4327_v37, %v3869_v39  ;;  %v4349_v37 = vld [vmem:[%s6494_s3 + $0x1e4] sm:$0xf]  ;;  %v3957_v39 = vld [vmem:[%s6494_s3 + $0x1e8] sm:$0xf0] }
 0x12c   :  { %2498 = vmatpush.bf16.msrb.mxu2 %v3896_v9  ;;  %v1862_v23 = vpop.f32.mrf.mxu3  ;;  %v1837_v61 = vadd.f32 %v6248_v5, %v1824_v54  ;;  %v3939_v9 = vld [vmem:[%s6494_s3 + $0x1c0] sm:$0xf]  ;;  %v3915_v31 = vld [vmem:[%s6494_s3 + $0x190] sm:$0xf]  ;;  %v3960_v46 = vor.u32 %v4349_v37, %v3957_v39  ;;  %v4345_v54 = vld [vmem:[%s6494_s3 + $0x1c4] sm:$0xf] }
 0x12d   :  { %2473 = vmatpush.bf16.msrb.mxu0 %v3760_v59  ;;  %v3864_v59 = vor.u32 %v4325_v50, %v3861_v51  ;;  %v3916_v33 = vor.u32 %v4340_v32, %v3915_v31  ;;  %v4368_v37 = vld [vmem:[%s6497_s5 + $0x78] sm:$0xff]  ;;  %v4359_v39 = vld [vmem:[%s6497_s5 + $0x30] sm:$0xff] }
 0x12e   :  { %v1850_v0 = vadd.f32 %v1849_v7, %v1837_v61  ;;  %v4344_v7 = vld [vmem:[%s6494_s3 + $0x1b4] sm:$0xf0] }
 0x12f   :  { %2486 = vmatpush.bf16.msrb.mxu1 %v3824_v60  ;;  %v4323_v60 = vld [vmem:[%s6494_s3 + $0x114] sm:$0xf] }
 0x130   :  { %2499 = vmatpush.bf16.msrb.mxu2 %v3888_v25  ;;  %v3856_v62 = vor.u32 %v4323_v60, %v3853_v18  ;;  %v3932_v25 = vor.u32 %v4344_v7, %v3931_v16  ;;  %v3933_v60 = vld [vmem:[%s6494_s3 + $0x1b8] sm:$0xf0]  ;;  %v293_v18 = vperm.slane %v6295_v34, 3 }
 0x131   :  { %2474 = vmatpush.bf16.msrb.mxu0 %v3752_v1  ;;  %v1851_v47 = vpop.f32.mrf.mxu2  ;;  %v3848_v1 = vor.u32 %v4321_v63, %v3845_v26  ;;  %v3925_v63 = vld [vmem:[%s6494_s3 + $0x1a8] sm:$0xf0]  ;;  %v3917_v34 = vld [vmem:[%s6494_s3 + $0x198] sm:$0xf0] }
 0x133   :  { %2487 = vmatpush.bf16.msrb.mxu1 %v3816_v19  ;;  %v1863_v19 = vadd.f32 %v1862_v23, %v1850_v0 }
 0x134   :  { %2500 = vmatpush.bf16.msrb.mxu2 %v3880_v38  ;;  %v1864_v49 = vpop.f32.mrf.mxu3  ;;  %v3907_v38 = vld [vmem:[%s6494_s3 + $0x180] sm:$0xf] }
 0x135   :  { %2475 = vmatpush.bf16.msrb.mxu0 %v3744_v10  ;;  %v4346_v10 = vld [vmem:[%s6494_s3 + $0x1c4] sm:$0xf0]  ;;  %v3949_v49 = vld [vmem:[%s6494_s3 + $0x1d8] sm:$0xf0] }
 0x136   :  { %v3940_v12 = vor.u32 %v4346_v10, %v3939_v9 }
 0x137   :  { %2488 = vmatpush.bf16.msrb.mxu1 %v3808_v11 }
 0x138   :  { %2501 = vmatpush.bf16.msrb.mxu2 %v3872_v48  ;;  %v4347_v48 = vld [vmem:[%s6494_s3 + $0x1d4] sm:$0xf] }
 0x139   :  { %2476 = vmatpush.bf16.msrb.mxu0 %v3736_v13  ;;  %v3952_v50 = vor.u32 %v4347_v48, %v3949_v49  ;;  %v4357_v48 = vld [vmem:[%s6497_s5 + $0x20] sm:$0xff]  ;;  %v4356_v49 = vld [vmem:[%s6497_s5 + $0x18] sm:$0xff] }
 0x13b   :  { %2489 = vmatpush.bf16.msrb.mxu1 %v3800_v27  ;;  %v3923_v27 = vld [vmem:[%s6494_s3 + $0x1a0] sm:$0xf] }
 0x13c   :  { %2502 = vmatpush.bf16.msrb.mxu2 %v3864_v59  ;;  %v3924_v24 = vor.u32 %v4342_v28, %v3923_v27  ;;  %v4343_v59 = vld [vmem:[%s6494_s3 + $0x1b4] sm:$0xf] }
 0x13d   :  { %2477 = vmatpush.bf16.msrb.mxu0 %v3728_v44  ;;  %v4338_v44 = vld [vmem:[%s6494_s3 + $0x184] sm:$0xf0]  ;;  %v3936_v61 = vor.u32 %v4343_v59, %v3933_v60  ;;  %v4364_v59 = vld [vmem:[%s6497_s5 + $0x58] sm:$0xff]  ;;  %v4363_v60 = vld [vmem:[%s6497_s5 + $0x50] sm:$0xff] }
 0x13e   :  { %v3908_v42 = vor.u32 %v4338_v44, %v3907_v38 }
 0x13f   :  { %2490 = vmatpush.bf16.msrb.mxu1 %v3792_v52  ;;  %v3965_v52 = vld [vmem:[%s6494_s3 + $0x1f8] sm:$0xf0] }
 0x140   :  { %2503 = vmatpush.bf16.msrb.mxu2 %v3856_v62  ;;  %v3968_v36 = vor.u32 %v4351_v35, %v3965_v52  ;;  %v4341_v62 = vld [vmem:[%s6494_s3 + $0x1a4] sm:$0xf] }
 0x141   :  { %2478 = vmatpush.bf16.msrb.mxu0 %v3720_v55  ;;  %v1875_v3 = vpop.f32.mrf.mxu0  ;;  %v3941_v55 = vld [vmem:[%s6494_s3 + $0x1c8] sm:$0xf0] }
 0x142   :  { %v1876_v4 = vadd.f32 %v1875_v3, %v1863_v19  ;;  %v4339_v19 = vld [vmem:[%s6494_s3 + $0x194] sm:$0xf] }
 0x143   :  { %2491 = vmatpush.bf16.msrb.mxu1 %v3784_v57  ;;  %v1888_v5 = vpop.f32.mrf.mxu1  ;;  %v3944_v57 = vor.u32 %v4345_v54, %v3941_v55  ;;  %v4354_v55 = vld [vmem:[%s6497_s5 + $0x8] sm:$0xff] }
 0x144   :  { %2479 = vmatmul.bf16.vlgmr.msrb.gmra.mxu0 %v6190_v43  ;;  %v4350_v43 = vld [vmem:[%s6494_s3 + $0x1e4] sm:$0xf0]  ;;  %2504 = vmatpush.bf16.msrb.mxu2 %v3848_v1  ;;  %v1889_v8 = vadd.f32 %v1888_v5, %v1876_v4  ;;  %v3928_v1 = vor.u32 %v4341_v62, %v3925_v63 }
 0x145   :  { %v3956_v22 = vor.u32 %v4350_v43, %v3955_v20  ;;  %v3920_v43 = vor.u32 %v4339_v19, %v3917_v34 }
 0x146   :  { %2492 = vmatmul.bf16.vlgmr.msrb.gmra.mxu1 %v6188_v40  ;;  %v4348_v40 = vld [vmem:[%s6494_s3 + $0x1d4] sm:$0xf0] }
 0x147   :  { %2459 = vmatpush.bf16.msra.mxu3 %v3956_v22  ;;  %v3948_v6 = vor.u32 %v4348_v40, %v3947_v2  ;;  %v4337_v22 = vld [vmem:[%s6494_s3 + $0x184] sm:$0xf]  ;;  %v3909_v2 = vld [vmem:[%s6494_s3 + $0x188] sm:$0xf0]  ;;  %2671 = vmatpush.bf16.msra.mxu1 %v4368_v37 }
 0x148   :  { %v3912_v3 = vor.u32 %v4337_v22, %v3909_v2 }
 0x149   :  { %v1901_v11 = vpop.f32.mrf.mxu2  ;;  %v1877_v21 = vpop.f32.mrf.mxu0 }
 0x14a   :  { %v1902_v14 = vadd.f32 %v1901_v11, %v1889_v8 }
 0x14b   :  { %2460 = vmatpush.bf16.msra.mxu3 %v3948_v6  ;;  %v1890_v23 = vpop.f32.mrf.mxu1 }
 0x14c   :  { %v1914_v15 = vpop.f32.mrf.mxu3 }
 0x14d   :  { %v1915_v17 = vadd.f32 %v1914_v15, %v1902_v14 }
 0x14f   :  { %2461 = vmatpush.bf16.msra.mxu3 %v3940_v12  ;;  %v2024_v13 = vmax.f32 %v1915_v17, 0.0 }
 0x151   :  { %v2028_v29 = vpack.c.bf16 %v2024_v13, %v2024_v13  ;;  %v1903_v30 = vpop.f32.mrf.mxu2  ;;  %v31_v13 = vld [vmem:[%s6495_s4] sm:$0x3] }
 0x152   :  { %v2095_v27 = vperm.slane %v31_v13, 0  ;;  %v2096_v32 = vperm.slane %v31_v13, 1 }
 0x153   :  { %2462 = vmatpush.bf16.msra.mxu3 %v3932_v25  ;;  %2453 = vmatmul.bf16.vlgmr.msra.gmra.mxu2 %v2028_v29 }
 0x154   :  { %v1916_v41 = vpop.f32.mrf.mxu3 }
 0x157   :  { %2463 = vmatpush.bf16.msra.mxu3 %v3924_v24 }
 0x15b   :  { %2464 = vmatpush.bf16.msra.mxu3 %v3916_v33 }
 0x15f   :  { %2465 = vmatpush.bf16.msra.mxu3 %v3908_v42 }
 0x161   :  { %v1927_v45 = vpop.f32.mrf.mxu0 }
 0x162   :  { %v1928_v20 = vadd.f32 %v1927_v45, %v293_v18  ;;  %v4367_v45 = vld [vmem:[%s6497_s5 + $0x70] sm:$0xff]  ;;  %v4362_v18 = vld [vmem:[%s6497_s5 + $0x48] sm:$0xff] }
 0x163   :  { %2510 = vmatpush.bf16.msrb.mxu3 %v3968_v36  ;;  %2505 = vmatmul.bf16.vlgmr.msrb.gmra.mxu2 %v2028_v29  ;;  %v1940_v47 = vpop.f32.mrf.mxu1  ;;  %v4360_v36 = vld [vmem:[%s6497_s5 + $0x38] sm:$0xff] }
 0x164   :  { %v1941_v40 = vadd.f32 %v1940_v47, %v1928_v20  ;;  %2658 = vmatpush.bf16.msra.mxu0 %v4360_v36  ;;  %2672 = vmatpush.bf16.msra.mxu1 %v4367_v45 }
 0x167   :  { %2511 = vmatpush.bf16.msrb.mxu3 %v3960_v46  ;;  %v4358_v46 = vld [vmem:[%s6497_s5 + $0x28] sm:$0xff] }
 0x168   :  { %2659 = vmatpush.bf16.msra.mxu0 %v4359_v39 }
 0x169   :  { %v1953_v51 = vpop.f32.mrf.mxu2  ;;  %v1929_v56 = vpop.f32.mrf.mxu0 }
 0x16a   :  { %v1954_v4 = vadd.f32 %v1953_v51, %v1941_v40  ;;  %v4355_v51 = vld [vmem:[%s6497_s5 + $0x10] sm:$0xff]  ;;  %v4366_v56 = vld [vmem:[%s6497_s5 + $0x68] sm:$0xff] }
 0x16b   :  { %2512 = vmatpush.bf16.msrb.mxu3 %v3952_v50  ;;  %v1942_v58 = vpop.f32.mrf.mxu1  ;;  %2673 = vmatpush.bf16.msra.mxu1 %v4366_v56 }
 0x16c   :  { %v1966_v53 = vpop.f32.mrf.mxu3  ;;  %2660 = vmatpush.bf16.msra.mxu0 %v4358_v46  ;;  %v4365_v58 = vld [vmem:[%s6497_s5 + $0x60] sm:$0xff] }
 0x16d   :  { %v1967_v5 = vadd.f32 %v1966_v53, %v1954_v4 }
 0x16f   :  { %2513 = vmatpush.bf16.msrb.mxu3 %v3944_v57  ;;  %v4353_v57 = vld [vmem:[%s6497_s5] sm:$0xff]  ;;  %2674 = vmatpush.bf16.msra.mxu1 %v4365_v58 }
 0x170   :  { %2661 = vmatpush.bf16.msra.mxu0 %v4357_v48 }
 0x171   :  { %v1955_v26 = vpop.f32.mrf.mxu2 }
 0x173   :  { %2514 = vmatpush.bf16.msrb.mxu3 %v3936_v61  ;;  %2675 = vmatpush.bf16.msra.mxu1 %v4364_v59  ;;  %v4361_v61 = vld [vmem:[%s6497_s5 + $0x40] sm:$0xff] }
 0x174   :  { %v1968_v0 = vpop.f32.mrf.mxu3  ;;  %2662 = vmatpush.bf16.msra.mxu0 %v4356_v49 }
 0x177   :  { %2515 = vmatpush.bf16.msrb.mxu3 %v3928_v1  ;;  %2676 = vmatpush.bf16.msra.mxu1 %v4363_v60 }
 0x178   :  { %2663 = vmatpush.bf16.msra.mxu0 %v4355_v51 }
 0x17b   :  { %2516 = vmatpush.bf16.msrb.mxu3 %v3920_v43  ;;  %2677 = vmatpush.bf16.msra.mxu1 %v4362_v18 }
 0x17c   :  { %2664 = vmatpush.bf16.msra.mxu0 %v4354_v55 }
 0x17f   :  { %2517 = vmatpush.bf16.msrb.mxu3 %v3912_v3  ;;  %2678 = vmatpush.bf16.msra.mxu1 %v4361_v61 }
 0x180   :  { %2665 = vmatpush.bf16.msra.mxu0 %v4353_v57 }
 0x181   :  { %v1979_v6 = vpop.f32.mrf.mxu0 }
 0x182   :  { %v1980_v9 = vadd.f32 %v1979_v6, %v1967_v5  ;;  %v4369_v5 = vld [vmem:[%s6496_s6] ss:$0 sm:$0xff] }
 0x183   :  { %v1992_v8 = vpop.f32.mrf.mxu1 }
 0x184   :  { %v1993_v10 = vadd.f32 %v1992_v8, %v1980_v9 }
 0x189   :  { %v2005_v11 = vpop.f32.mrf.mxu2  ;;  %v1981_v15 = vpop.f32.mrf.mxu0 }
 0x18a   :  { %v2006_v12 = vadd.f32 %v2005_v11, %v1993_v10  ;;  %v2018_v14 = vpop.f32.mrf.mxu3 }
 0x18b   :  { %v1994_v16 = vpop.f32.mrf.mxu1 }
 0x18c   :  { %v2019_v7 = vadd.f32 %v2018_v14, %v2006_v12 }
 0x18e   :  { %v2025_v17 = vmax.f32 %v2019_v7, 0.0 }
 0x190   :  { %v2029_v21 = vpack.c.bf16 %v2025_v17, %v2025_v17 }
 0x191   :  { %v2007_v23 = vpop.f32.mrf.mxu2 }
 0x192   :  { %v2020_v25 = vpop.f32.mrf.mxu3  ;;  %2466 = vmatmul.bf16.vlgmr.msra.gmra.mxu3 %v2029_v21 }
 0x1a1   :  { %v2428_v28 = vpop.f32.mrf.mxu0 }
 0x1a2   :  { %v2429_v29 = vadd.f32 %v2428_v28, %v2095_v27  ;;  %2518 = vmatmul.bf16.vlgmr.msrb.gmra.mxu3 %v2029_v21 }
 0x1a3   :  { %v2441_v30 = vpop.f32.mrf.mxu1 }
 0x1a4   :  { %v2442_v24 = vadd.f32 %v2441_v30, %v2429_v29 }
 0x1a9   :  { %v2430_v41 = vpop.f32.mrf.mxu0 }
 0x1ab   :  { %v2443_v31 = vpop.f32.mrf.mxu1 }
 0x1c1   :  { %v2480_v33 = vpop.f32.mrf.mxu0 }
 0x1c2   :  { %v2481_v38 = vadd.f32 %v2480_v33, %v2096_v32 }
 0x1c3   :  { %v2493_v44 = vpop.f32.mrf.mxu1 }
 0x1c4   :  { %v2494_v42 = vadd.f32 %v2493_v44, %v2481_v38 }
 0x1c9   :  { %v2482_v35 = vpop.f32.mrf.mxu0 }
 0x1cb   :  { %v2495_v52 = vpop.f32.mrf.mxu1 }
 0x1d6   :  { %v2454_v47 = vpop.f32.mrf.mxu2 }
 0x1d7   :  { %v2455_v62 = vadd.f32 %v2454_v47, %v2442_v24 }
 0x1de   :  { %v2456_v50 = vpop.f32.mrf.mxu2 }
 0x1e6   :  { %v2506_v53 = vpop.f32.mrf.mxu2 }
 0x1e7   :  { %v2507_v34 = vadd.f32 %v2506_v53, %v2494_v42 }
 0x1ee   :  { %v2508_v54 = vpop.f32.mrf.mxu2 }
 0x215   :  { %v2467_v63 = vpop.f32.mrf.mxu3 }
 0x216   :  { %v2468_v26 = vadd.f32 %v2467_v63, %v2455_v62 }
 0x218   :  { %v2523_v0 = vmax.f32 %v2468_v26, 0.0 }
 0x21a   :  { %v2525_v1 = vpack.c.bf16 %v2523_v0, %v2523_v0 }
 0x21c   :  { %2666 = vmatmul.bf16.vlgmr.msra.gmra.mxu0 %v2525_v1 }
 0x21d   :  { %v2469_v19 = vpop.f32.mrf.mxu3 }
 0x225   :  { %v2519_v20 = vpop.f32.mrf.mxu3 }
 0x226   :  { %v2520_v43 = vadd.f32 %v2519_v20, %v2507_v34 }
 0x228   :  { %v2524_v22 = vmax.f32 %v2520_v43, 0.0 }
 0x22a   :  { %v2526_v2 = vpack.c.bf16 %v2524_v22, %v2524_v22 }
 0x22c   :  { %2679 = vmatmul.bf16.vlgmr.msra.gmra.mxu1 %v2526_v2 }
 0x22d   :  { %v2521_v40 = vpop.f32.mrf.mxu3 }
 0x299   :  { %v2667_v3 = vpop.f32.mrf.mxu0 }
 0x29a   :  { %v2668_v6 = vadd.f32 %v4369_v5, %v2667_v3 }
 0x2a1   :  { %v2669_v4 = vpop.f32.mrf.mxu0 }
 0x2a9   :  { %v2680_v8 = vpop.f32.mrf.mxu1 }
 0x2aa   :  { %v2681_v9 = vadd.f32 %v2680_v8, %v2668_v6 }
 0x2ac   :  { %2684 = vst [vmem:[%s6498_s7] sm:$0xff] %v2681_v9 }
 0x2b1   :  { %v2682_v10 = vpop.f32.mrf.mxu1 }

</bundles_post_ra>
